<compile_context>
chip_gen: v7x
topology: tpu7x:2x2x1
jax: 0.10.0
libtpu: 0.0.40
codegen_flags: <defaults>
</compile_context>

<pallas_src>
import functools
import math

import jax
import jax.numpy as jnp
from jax import lax
from jax.experimental import pallas as pl
from jax.experimental.pallas import tpu as pltpu


# --------------------------------------------------------------------------- utils
def _pick_tile(dim, prefs):
    """Largest preferred tile that evenly divides `dim` (fallback: the full dim)."""
    for p in prefs:
        if p <= dim and dim % p == 0:
            return p
    return dim


@functools.lru_cache(maxsize=1)
def _vmem_limit_bytes():
    """Scoped VMEM limit scaled to the chip (~96 MiB on v5e/v6e, ~48 MiB on v7x)."""
    default = 32 * 1024 * 1024
    try:
        cap = pltpu.get_tpu_info().vmem_capacity_bytes
        return int(max(default, min(cap * 3 // 4, 100 * 1024 * 1024)))
    except Exception:
        return default


# ------------------------------------------------------------ tiled projection matmul
def _matmul_kernel(x_ref, w_ref, o_ref, acc_ref):
    @pl.when(pl.program_id(2) == 0)
    def _init():
        acc_ref[...] = jnp.zeros_like(acc_ref)

    acc_ref[...] += jnp.dot(x_ref[...], w_ref[...],
                            preferred_element_type=jnp.float32)

    @pl.when(pl.program_id(2) == pl.num_programs(2) - 1)
    def _store():
        o_ref[...] = acc_ref[...].astype(o_ref.dtype)


def _select_matmul_tiles(M, K, N, in_itemsize, out_itemsize):
    # Big tiles -> fewer HBM re-reads (weights re-read M/tm times, activations N/tn
    # times).  Capped by a VMEM budget so the double-buffered footprint stays safe on
    # v7x's 64 MiB per-core VMEM while v5e/v6e can use the full large tiles.
    tm = _pick_tile(M, (512, 256, 128, 64, 32, 16, 8))
    tn = _pick_tile(N, (512, 256, 128))
    tk = _pick_tile(K, (1024, 512, 256, 128))
    budget = int(_vmem_limit_bytes() * 0.6)

    def footprint(a, b, c):
        # 2x double-buffered inputs + fp32 accumulator + 2x double-buffered output
        return 2 * (a * c + c * b) * in_itemsize + a * b * 4 + 2 * a * b * out_itemsize

    while footprint(tm, tn, tk) > budget:
        if tk > 128 and tk % 2 == 0:      # tk does not change HBM traffic: shrink first
            tk //= 2
        elif tm > 8 and tm % 2 == 0:
            tm //= 2
        elif tn > 128 and tn % 2 == 0:
            tn //= 2
        else:
            break
    return tm, tn, tk


def _matmul(x2d, w_t, out_dtype):
    """x2d: (M, K), w_t: (K, N) already transposed to (in, out). Returns (M, N)."""
    M, K = x2d.shape
    K2, N = w_t.shape
    assert K == K2
    tm, tn, tk = _select_matmul_tiles(M, K, N, x2d.dtype.itemsize,
                                      jnp.dtype(out_dtype).itemsize)

    return pl.pallas_call(
        _matmul_kernel,
        out_shape=jax.ShapeDtypeStruct((M, N), out_dtype),
        grid_spec=pltpu.PrefetchScalarGridSpec(
            num_scalar_prefetch=0,
            grid=(M // tm, N // tn, K // tk),
            in_specs=[
                pl.BlockSpec((tm, tk), lambda i, j, k: (i, k)),
                pl.BlockSpec((tk, tn), lambda i, j, k: (k, j)),
            ],
            out_specs=pl.BlockSpec((tm, tn), lambda i, j, k: (i, j)),
            scratch_shapes=[pltpu.VMEM((tm, tn), jnp.float32)],
        ),
        compiler_params=pltpu.CompilerParams(
            dimension_semantics=("parallel", "parallel", "arbitrary"),
            vmem_limit_bytes=_vmem_limit_bytes(),
        ),
    )(x2d, w_t)


# --------------------------------------- RoPE + head-major relayout (single pass)
def _rope_relayout_kernel(qkv_ref, cos_ref, sin_ref, o_ref, *, nh):
    # head index: 0..nh-1 -> Q heads, nh..2nh-1 -> K heads, 2nh..3nh-1 -> V heads
    h = pl.program_id(2)

    @pl.when(h < 2 * nh)
    def _rope_qk():
        x = qkv_ref[0]                               # (ts, hd)
        half = x.shape[-1] // 2
        rot = jnp.concatenate([-x[:, half:], x[:, :half]], axis=-1)   # rotate_half
        o_ref[0, 0] = (x * cos_ref[...] + rot * sin_ref[...]).astype(o_ref.dtype)

    @pl.when(h >= 2 * nh)
    def _copy_v():
        o_ref[0, 0] = qkv_ref[0]


def _rope_relayout(qkv, cos, sin, *, num_heads, head_dim):
    """qkv: (B, S, 3*hidden) -> (B, 3*nh, S, hd) with RoPE applied to Q/K heads."""
    B, S, _ = qkv.shape
    nh = num_heads
    ts = _pick_tile(S, (512, 256, 128, 64, 32, 16, 8))
    kernel = functools.partial(_rope_relayout_kernel, nh=nh)

    return pl.pallas_call(
        kernel,
        out_shape=jax.ShapeDtypeStruct((B, 3 * nh, S, head_dim), qkv.dtype),
        grid_spec=pltpu.PrefetchScalarGridSpec(
            num_scalar_prefetch=0,
            # head axis innermost: cos/sin tiles stay resident across all heads
            grid=(B, S // ts, 3 * nh),
            in_specs=[
                pl.BlockSpec((1, ts, head_dim), lambda b, si, h: (b, si, h)),
                pl.BlockSpec((ts, head_dim), lambda b, si, h: (si, 0)),
                pl.BlockSpec((ts, head_dim), lambda b, si, h: (si, 0)),
            ],
            out_specs=pl.BlockSpec((1, 1, ts, head_dim), lambda b, si, h: (b, h, si, 0)),
        ),
        compiler_params=pltpu.CompilerParams(
            dimension_semantics=("parallel", "parallel", "parallel"),
            vmem_limit_bytes=_vmem_limit_bytes(),
        ),
    )(qkv, cos, sin)


# --------------------------------------------------- flash attention (online softmax)
def _flash_body(q_ref, k_ref, v_ref, mask_ref, o_ref, m_sc, l_sc, acc_sc,
                *, causal, exp_dtype):
    qi = pl.program_id(2)
    ki = pl.program_id(3)
    tq = q_ref.shape[-2]
    tk = k_ref.shape[-2]
    neg_min = jnp.finfo(jnp.float32).min

    @pl.when(ki == 0)
    def _init():
        m_sc[...] = jnp.full_like(m_sc, -jnp.inf)
        l_sc[...] = jnp.zeros_like(l_sc)
        acc_sc[...] = jnp.zeros_like(acc_sc)

    def _compute():
        q = q_ref[0, 0]                       # (tq, hd): already RoPE'd, scale folded in
        k = k_ref[0, 0]                       # (tk, hd): already RoPE'd
        # scores: contract head_dim with head_dim (no explicit transpose op)
        s = lax.dot_general(q, k, dimension_numbers=(((1,), (1,)), ((), ())),
                            preferred_element_type=jnp.float32)
        if causal:
            # causal mask generated in-kernel: zero HBM mask traffic
            row = qi * tq + lax.broadcasted_iota(jnp.int32, (tq, tk), 0)
            col = ki * tk + lax.broadcasted_iota(jnp.int32, (tq, tk), 1)
            s = jnp.where(col > row, neg_min, s)
        elif mask_ref is not None:
            # torch semantics: masked_fill_(mask != 0, finfo.min)
            s = jnp.where(mask_ref[0, 0].astype(jnp.int32) != 0, neg_min, s)

        m_prev = m_sc[...]
        m_new = jnp.maximum(m_prev, jnp.max(s, axis=-1, keepdims=True))
        # exp in bf16 for bf16 models (fast EUP on v6e/v7x), f32 otherwise; accumulate f32
        alpha = jnp.exp((m_prev - m_new).astype(exp_dtype)).astype(jnp.float32)
        p = jnp.exp((s - m_new).astype(exp_dtype))
        l_sc[...] = alpha * l_sc[...] + jnp.sum(p.astype(jnp.float32), axis=-1,
                                                keepdims=True)
        acc_sc[...] = alpha * acc_sc[...] + jnp.dot(p.astype(v_ref.dtype), v_ref[0, 0],
                                                    preferred_element_type=jnp.float32)
        m_sc[...] = m_new

    if causal:
        # skip kv tiles entirely above the diagonal (fully masked): ~2x less work
        pl.when(ki * tk < (qi + 1) * tq)(_compute)
    else:
        _compute()

    @pl.when(ki == pl.num_programs(3) - 1)
    def _finalize():
        o_ref[0] = (acc_sc[...] / l_sc[...]).astype(o_ref.dtype)


def _flash_attention(qkvh, mask_i8, *, num_heads, head_dim, out_dtype, causal):
    """qkvh: (B, 3*nh, S, hd) head-major, already RoPE'd. Returns (B, S, hidden)."""
    B, _, S, hd = qkvh.shape
    nh = num_heads
    hidden = nh * hd
    # Large q/kv tiles: K/V streaming scales as 1/tq (biggest relative win on v5e).
    tq = _pick_tile(S, (256, 128, 64, 32, 16, 8))
    tk = _pick_tile(S, (256, 128, 64, 32, 16, 8))
    exp_dtype = jnp.bfloat16 if qkvh.dtype == jnp.bfloat16 else jnp.float32
    has_mask = (mask_i8 is not None) and (not causal)

    if has_mask:
        def kernel(q_ref, k_ref, v_ref, mask_ref, o_ref, m_sc, l_sc, acc_sc):
            _flash_body(q_ref, k_ref, v_ref, mask_ref, o_ref, m_sc, l_sc, acc_sc,
                        causal=False, exp_dtype=exp_dtype)
    else:
        def kernel(q_ref, k_ref, v_ref, o_ref, m_sc, l_sc, acc_sc):
            _flash_body(q_ref, k_ref, v_ref, None, o_ref, m_sc, l_sc, acc_sc,
                        causal=causal, exp_dtype=exp_dtype)

    in_specs = [
        pl.BlockSpec((1, 1, tq, hd), lambda b, h, qi, ki: (b, h, qi, 0)),            # Q
        pl.BlockSpec((1, 1, tk, hd), lambda b, h, qi, ki: (b, nh + h, ki, 0)),       # K
        pl.BlockSpec((1, 1, tk, hd), lambda b, h, qi, ki: (b, 2 * nh + h, ki, 0)),   # V
    ]
    args = [qkvh, qkvh, qkvh]
    if has_mask:
        # TODO(synk): dense mask tiles are re-fetched per head; prefer causal=True (or a
        #             (B,S) padding vector) whenever the mask allows it.
        in_specs.append(pl.BlockSpec((1, 1, tq, tk), lambda b, h, qi, ki: (b, 0, qi, ki)))
        args.append(mask_i8)

    return pl.pallas_call(
        kernel,
        out_shape=jax.ShapeDtypeStruct((B, S, hidden), out_dtype),
        grid_spec=pltpu.PrefetchScalarGridSpec(
            num_scalar_prefetch=0,
            grid=(B, nh, S // tq, S // tk),
            in_specs=in_specs,
            out_specs=pl.BlockSpec((1, tq, hd), lambda b, h, qi, ki: (b, qi, h)),
            scratch_shapes=[
                pltpu.VMEM((tq, 1), jnp.float32),     # running max
                pltpu.VMEM((tq, 1), jnp.float32),     # running denom
                pltpu.VMEM((tq, hd), jnp.float32),    # fp32 output accumulator
            ],
        ),
        compiler_params=pltpu.CompilerParams(
            dimension_semantics=("parallel", "parallel", "parallel", "arbitrary"),
            vmem_limit_bytes=_vmem_limit_bytes(),
        ),
    )(*args)


# ----------------------------------------------------------------------- public wrapper
def llama_attention(hidden_states, wq, wk, wv, wo, cos, sin,
                    attention_mask=None, *, num_heads, causal=False):
    """LlamaAttention.forward.

    causal=True generates the causal mask in-kernel (no (B,1,S,S) mask traffic, and kv
    tiles above the diagonal are skipped); an attention_mask passed alongside
    causal=True is assumed to be exactly causal and is not read.
    """
    B, S, hidden = hidden_states.shape
    head_dim = hidden // num_heads
    if head_dim * num_heads != hidden:
        raise ValueError("hidden_size must be divisible by num_heads")
    if head_dim % 128 != 0:
        # TODO(synk): head_dim=64 models need a packed per-head lane layout; unsupported.
        raise ValueError("head_dim must be a multiple of 128 (TPU lane width)")
    dtype = hidden_states.dtype
    sm_scale = 1.0 / math.sqrt(head_dim)

    # One-time layout prep (XLA side, outside the kernels):
    #  - pre-transpose weights to (in, out), fuse Q/K/V into one wide matmul,
    #    and fold the softmax scale into the Q columns (RoPE is linear in q).
    w_qkv_t = jnp.concatenate([wq.T * sm_scale, wk.T, wv.T], axis=1).astype(dtype)  # (H,3H)
    wo_t = wo.T.astype(dtype)                                                       # (H,H)

    cos2d = jnp.asarray(cos).reshape(-1, head_dim)[:S].astype(dtype)                # (S,hd)
    sin2d = jnp.asarray(sin).reshape(-1, head_dim)[:S].astype(dtype)                # (S,hd)

    mask_i8 = None
    if (attention_mask is not None) and (not causal):
        mask_i8 = (attention_mask != 0).astype(jnp.int8)

    # 1) fused QKV projection (K-tiled, fp32 accumulation, softmax scale folded into Wq)
    x2d = hidden_states.reshape(B * S, hidden)
    qkv = _matmul(x2d, w_qkv_t, dtype).reshape(B, S, 3 * hidden)

    # 2) RoPE + head-major relayout (contiguous per-head K/V tiles for the flash DMAs)
    qkvh = _rope_relayout(qkv, cos2d, sin2d, num_heads=num_heads, head_dim=head_dim)

    # 3) flash attention (online softmax; causal mask generated in-kernel)
    ctx = _flash_attention(qkvh, mask_i8, num_heads=num_heads, head_dim=head_dim,
                           out_dtype=dtype, causal=causal)

    # 4) output projection
    out = _matmul(ctx.reshape(B * S, hidden), wo_t, dtype).reshape(B, S, hidden)
    return out


# -------------------------- pure-JAX reference (mirrors the PyTorch forward) ------------
def _rotate_half(x):
    d = x.shape[-1]
    return jnp.concatenate([-x[..., d // 2:], x[..., : d // 2]], axis=-1)


def reference_attention(x, wq, wk, wv, wo, cos, sin, mask, num_heads):
    bsz, s, hidden = x.shape
    hd = hidden // num_heads
    q = (x @ wq.T).reshape(bsz, s, num_heads, hd).transpose(0, 2, 1, 3)
    k = (x @ wk.T).reshape(bsz, s, num_heads, hd).transpose(0, 2, 1, 3)
    v = (x @ wv.T).reshape(bsz, s, num_heads, hd).transpose(0, 2, 1, 3)
    c = cos[None, None]
    si = sin[None, None]
    q = q * c + _rotate_half(q) * si
    k = k * c + _rotate_half(k) * si
    w = jnp.einsum("bhqd,bhkd->bhqk", q, k) / math.sqrt(hd)
    if mask is not None:
        w = jnp.where(mask != 0, jnp.finfo(jnp.float32).min, w)
    w = jax.nn.softmax(w.astype(jnp.float32), axis=-1).astype(x.dtype)
    o = jnp.einsum("bhqk,bhkd->bhqd", w, v)
    o = o.transpose(0, 2, 1, 3).reshape(bsz, s, hidden)
    return o @ wo.T


if __name__ == "__main__":
    # Small but tiling-exercising shapes: head_dim = 128 (Llama-canonical), 2 heads,
    # seq 512 -> multiple q/kv tiles so the online softmax, causal tile-skipping,
    # the RoPE relayout pass and the K-tiled projections are all exercised.
    bsz, seq, hidden, num_heads = 2, 512, 256, 2
    head_dim = hidden // num_heads

    key = jax.random.PRNGKey(0)
    kx, kq, kk, kv, ko = jax.random.split(key, 5)

    x = jax.random.normal(kx, (bsz, seq, hidden), dtype=jnp.float32)
    wscale = 1.0 / math.sqrt(hidden)
    wq = jax.random.uniform(kq, (hidden, hidden), jnp.float32, -wscale, wscale)
    wk = jax.random.uniform(kk, (hidden, hidden), jnp.float32, -wscale, wscale)
    wv = jax.random.uniform(kv, (hidden, hidden), jnp.float32, -wscale, wscale)
    wo = jax.random.uniform(ko, (hidden, hidden), jnp.float32, -wscale, wscale)

    # rotary embeddings (same recipe as LlamaRotaryEmbedding)
    inv_freq = 1.0 / (10000.0 ** (jnp.arange(0, head_dim, 2, dtype=jnp.float32) / head_dim))
    pos = jnp.arange(seq, dtype=jnp.float32)
    freqs = pos[:, None] * inv_freq[None, :]
    emb = jnp.concatenate([freqs, freqs], axis=-1)          # (seq, head_dim)
    cos = jnp.cos(emb)
    sin = jnp.sin(emb)

    # causal mask: nonzero above the diagonal gets masked_fill'd with dtype min
    causal_bool = jnp.arange(seq)[None, :] > jnp.arange(seq)[:, None]
    mask = jnp.broadcast_to(causal_bool[None, None], (bsz, 1, seq, seq)).astype(jnp.int32)

    ref = jax.block_until_ready(
        reference_attention(x, wq, wk, wv, wo, cos, sin, mask, num_heads))

    # Fast path: causal mask generated in-kernel (no mask traffic, tiles skipped).
    out_causal = llama_attention(x, wq, wk, wv, wo, cos, sin, None,
                                 num_heads=num_heads, causal=True)
    out_causal = jax.block_until_ready(out_causal)
    assert out_causal.shape == (bsz, seq, hidden)
    err_c = float(jnp.max(jnp.abs(out_causal - ref)))
    assert jnp.allclose(out_causal, ref, atol=3e-2, rtol=3e-2), (
        "causal path mismatch vs reference: max abs err = %f" % err_c)

    # Generic path: arbitrary dense attention_mask streamed as int8 tiles.
    out_masked = llama_attention(x, wq, wk, wv, wo, cos, sin, mask,
                                 num_heads=num_heads, causal=False)
    out_masked = jax.block_until_ready(out_masked)
    err_m = float(jnp.max(jnp.abs(out_masked - ref)))
    assert jnp.allclose(out_masked, ref, atol=3e-2, rtol=3e-2), (
        "masked path mismatch vs reference: max abs err = %f" % err_m)

    print("KERNEL_OK")
</pallas_src>

<mosaic_0001>
module attributes {stable_mosaic.version = 11 : i64} {
  func.func @_matmul_kernel(%arg0: i32, %arg1: i32, %arg2: i32, %arg3: memref<512x256xf32, #tpu.memory_space<vmem>>, %arg4: memref<256x256xf32, #tpu.memory_space<vmem>>, %arg5: memref<512x256xf32, #tpu.memory_space<vmem>>, %arg6: memref<512x256xf32, #tpu.memory_space<vmem>>) attributes {dimension_semantics = [#tpu.dimension_semantics<parallel>, #tpu.dimension_semantics<parallel>, #tpu.dimension_semantics<arbitrary>], iteration_bounds = array<i64: 2, 3, 1>, scalar_prefetch = 0 : i64, scratch_operands = 1 : i64, tpu.core_type = #tpu.core_type<tc>, window_params = [{transform_indices = @transform_0, window_bounds = array<i64: 512, 256>}, {transform_indices = @transform_1, window_bounds = array<i64: 256, 256>}, {transform_indices = @transform_2, window_bounds = array<i64: 512, 256>}]} {
    %c0_i32 = arith.constant 0 : i32
    %0 = arith.cmpi eq, %arg2, %c0_i32 : i32
    %1 = arith.extui %0 : i1 to i32
    %c0_i32_0 = arith.constant 0 : i32
    %2 = arith.cmpi ne, %1, %c0_i32_0 : i32
    scf.if %2 {
      %cst_10 = arith.constant 0.000000e+00 : f32
      %12 = vector.broadcast %cst_10 : f32 to vector<512x256xf32>
      %c0_11 = arith.constant 0 : index
      %c0_12 = arith.constant 0 : index
      %13 = vector.load %arg6[%c0_11, %c0_12] : memref<512x256xf32, #tpu.memory_space<vmem>>, vector<512x256xf32>
      tpu.vector_store %arg6[%c0_11, %c0_12], %12 {strides = array<i32>} : memref<512x256xf32, #tpu.memory_space<vmem>>, vector<512x256xf32>,
    } else {
    }
    %c0 = arith.constant 0 : index
    %c0_1 = arith.constant 0 : index
    %3 = vector.load %arg6[%c0, %c0_1] : memref<512x256xf32, #tpu.memory_space<vmem>>, vector<512x256xf32>
    %c0_2 = arith.constant 0 : index
    %c0_3 = arith.constant 0 : index
    %4 = vector.load %arg3[%c0_2, %c0_3] : memref<512x256xf32, #tpu.memory_space<vmem>>, vector<512x256xf32>
    %c0_4 = arith.constant 0 : index
    %c0_5 = arith.constant 0 : index
    %5 = vector.load %arg4[%c0_4, %c0_5] : memref<256x256xf32, #tpu.memory_space<vmem>>, vector<256x256xf32>
    %cst = arith.constant dense<0.000000e+00> : vector<512x256xf32>
    %6 = tpu.matmul %4, %5, %cst {dimension_numbers = #tpu.dot_dimension_numbers<[1], [0], [0], [1], [0, 0, 1, 1], [], []>} : vector<512x256xf32>, vector<256x256xf32>, vector<512x256xf32> -> vector<512x256xf32>
    %7 = arith.addf %3, %6 : vector<512x256xf32>
    %c0_6 = arith.constant 0 : index
    %c0_7 = arith.constant 0 : index
    %8 = vector.load %arg6[%c0_6, %c0_7] : memref<512x256xf32, #tpu.memory_space<vmem>>, vector<512x256xf32>
    tpu.vector_store %arg6[%c0_6, %c0_7], %7 {strides = array<i32>} : memref<512x256xf32, #tpu.memory_space<vmem>>, vector<512x256xf32>,
    %c0_i32_8 = arith.constant 0 : i32
    %9 = arith.cmpi eq, %arg2, %c0_i32_8 : i32
    %10 = arith.extui %9 : i1 to i32
    %c0_i32_9 = arith.constant 0 : i32
    %11 = arith.cmpi ne, %10, %c0_i32_9 : i32
    scf.if %11 {
      %c0_10 = arith.constant 0 : index
      %c0_11 = arith.constant 0 : index
      %12 = vector.load %arg6[%c0_10, %c0_11] : memref<512x256xf32, #tpu.memory_space<vmem>>, vector<512x256xf32>
      %c0_12 = arith.constant 0 : index
      %c0_13 = arith.constant 0 : index
      %13 = vector.load %arg5[%c0_12, %c0_13] : memref<512x256xf32, #tpu.memory_space<vmem>>, vector<512x256xf32>
      tpu.vector_store %arg5[%c0_12, %c0_13], %12 {strides = array<i32>} : memref<512x256xf32, #tpu.memory_space<vmem>>, vector<512x256xf32>,
    } else {
    }
    return
  }
  func.func @transform_0(%arg0: i32, %arg1: i32, %arg2: i32) -> (i32, i32) {
    %c0_i32 = arith.constant 0 : i32
    return %arg0, %arg2 : i32, i32
  }
  func.func @transform_1(%arg0: i32, %arg1: i32, %arg2: i32) -> (i32, i32) {
    %c0_i32 = arith.constant 0 : i32
    return %arg2, %arg1 : i32, i32
  }
  func.func @transform_2(%arg0: i32, %arg1: i32, %arg2: i32) -> (i32, i32) {
    %c0_i32 = arith.constant 0 : i32
    return %arg0, %arg1 : i32, i32
  }
}

</mosaic_0001>

<bundles_post_ra>
// kernel: tpu_custom_call.1
= control target key start
LH: loop header
LB: loop body
LE: loop exit
PB: predicated region body
PF: predicated region fallthrough
CT: control target
= control target key end

     0   :  { %s2962_s0 = inlined_call_operand.hbm [shape: f32[1024,256], index: 0, kind: input, shape index: {}]   ;;  %s2963_s1 = inlined_call_operand.hbm [shape: f32[256,768], index: 1, kind: input, shape index: {}]   ;;  %s2964_s2 = inlined_call_operand.hbm [shape: f32[1024,768], index: 2, kind: output, shape index: {}]  }
   0x1   :  { %2978 = sst [smem:[#allocation18_spill]] %s2962_s0 }
   0x2   :  { %2979 = sst [smem:[#allocation19_spill]] %s2964_s2 }
   0x3   :  { %7 = vsyncpa [#allocation4], 0 }
   0x4   :  { %9 = vsyncpa [#allocation4 + $0x1], 0 }
   0x5   :  { %10 = vsyncpa [#allocation7], 0 }
   0x6   :  { %12 = vsyncpa [#allocation7 + $0x1], 0 }
   0x7   :  { %13 = vsyncpa [#allocation5], 0 }
   0x8   :  { %15 = vsyncpa [#allocation5 + $0x1], 0  ;;  %s2286_s9 = smov 0   ;;  %s2288_s10 = smov 0  }
   0x9   :  { %s2290_s11 = smov 0   ;;  %s2292_s12 = smov 0  }
   0xa   :  { %s2294_s13 = smov 0   ;;  %s2296_s14 = smov 0  }
   0xb   :  { %s2298_s15 = smov 0   ;;  %s2300_s16 = smov 0  }
   0xc   :  { %s2302_s17 = smov 0   ;;  %s2304_s18 = smov 0  }
   0xd   :  { %s2306_s19 = smov 0   ;;  %s2308_s20 = smov 0  }
   0xe   :  { %s2310_s21 = smov 0   ;;  %s2312_s22 = smov 0  }
   0xf LB: > { %2980 = sst [smem:[#allocation12_spill]] %s2244_s18  ;;  %s1791_s23 = sadd.s32 4294967295, %s2260_s22   ;;  %s2260_s22 = sphi %s2312_s22, %s21_s22   ;;  %s2256_s21 = sphi %s2310_s21, %s3014_s21   ;;  %s2252_s20 = sphi %s2308_s20, %s3025_s20   ;;  %s2248_s19 = sphi %s2306_s19, %s3012_s19   ;;  %s2244_s18 = sphi %s2304_s18, %s3024_s18   ;;  %s2240_s17 = sphi %s2302_s17, %s3023_s17   ;;  %s2236_s16 = sphi %s2300_s16, %s3022_s16   ;;  %s2232_s15 = sphi %s2298_s15, %s3021_s15   ;;  %s2228_s14 = sphi %s2296_s14, %s3020_s14   ;;  %s2224_s13 = sphi %s2294_s13, %s3019_s13   ;;  %s2220_s12 = sphi %s2292_s12, %s3018_s12   ;;  %s2216_s11 = sphi %s2290_s11, %s3017_s11   ;;  %s2212_s10 = sphi %s2288_s10, %s3016_s10   ;;  %s2208_s9 = sphi %s2286_s9, %s3015_s9  }
  0x10   : > { %2981 = sst [smem:[#allocation13_spill]] %s2256_s21  ;;  %s40_s24 = sadd.s32 1, %s2256_s21 }
  0x11   : > { %p56_p0 = scmp.ne.s32.totalorder %s2240_s17, %s2236_s16  ;;  %p2966_p1 = scmp.eq.s32.totalorder %s2260_s22, 0 }
  0x12   : > { %p62_p2 = scmp.ne.s32.totalorder %s2236_s16, %s2232_s15  ;;  %p2361_p3 = scmp.eq.s32.totalorder %s1791_s23, 0 }
  0x13   : > { %p2365_p4 = scmp.eq.s32.totalorder %s1791_s23, 5  ;;  %p58_p5 = por %p2966_p1, %p56_p0 }
  0x14   : > { %p2373_p6 = por %p2361_p3, %p62_p2  ;;  %p2965_p7 = scmp.lt.s32.totalorder %s2260_s22, 6 }
  0x15   : > { %s2983_s27 = scalar_select %p2365_p4, 1, 0 }
  0x16   : > { %s2984_s28 = scalar_select %p2373_p6, 1, 0 }
  0x17   : > { %s142_s29 = sand.u32 1, %s2240_s17   ;;  %s1814_s30 = sshll.u32 %s2256_s21, 14 }
  0x18   : > { %s1795_s3 = sshll.u32 %s142_s29, 10  ;;  %s2985_s0 = sld [smem:[#allocation18_spill]] }
  0x19   : > { %s146_s7 = scalar_lea.vmem [#allocation3], %s1795_s3  ;;  %p2387_p8 = pnand %p2965_p7, %p58_p5 }
  0x1a   : > { %s156_s8 = sshll.u32 %s146_s7, 4  ;;  %s2393_s23 = scalar_lea.sflag [#allocation4], %s142_s29  ;;  %s2391_s8 = int_to_ptr.vmem [resolvable:$true] %s156_s8 }
  0x1b   : > { %p2052_p10 = pneg %p2387_p8 }
  0x1e   : > { %s2383_s6 = scalar_lea.hbm %s2985_s0, %s1814_s30  ;;  %s2055_s5 = scalar_lea.hbm %s2985_s0, 32768 }
  0x1f   : > { %s2050_s4 = scalar_lea.hbm %s2383_s6, 16384  ;;  %p2056_p13 = scmp.lt.u32.totalorder %s2383_s6, %s2985_s0 }
  0x20   : > { %p2051_p9 = scmp.ne.s32.totalorder %s2383_s6, %s2050_s4  ;;  %p2057_p0 = scmp.lt.u32.totalorder %s2055_s5, %s2050_s4 }
  0x21   : > { %p2059_p5 = scmp.lt.u32.totalorder %s2050_s4, %s2383_s6 }
  0x22   : > { %p2053_p11 = pnand %p2052_p10, %p2051_p9  ;;  %p2058_p2 = por %p2057_p0, %p2056_p13 }
  0x24   : > { %p2054_p12 = pneg %p2053_p11  ;;  %p2060_p7 = por %p2059_p5, %p2058_p2 }
  0x26   : > { %p2061_p1 = pnand %p2060_p7, %p2054_p12 }
  0x28   : > { %2064 = shalt.err (!%p2061_p1)
}
  0x29   : > { %s2065_s29 = scalar_lea.vmem %s2391_s8, 16384  ;;  %s2262_s30 = smov [#allocation3]  }
  0x2a   : > { %p2066_p9 = scmp.ne.s32.totalorder %s2391_s8, %s2065_s29  ;;  %s2070_s3 = sshll.u32 %s2262_s30, 4  ;;  %s2071_s3 = int_to_ptr.vmem [resolvable:$false] %s2070_s3 }
  0x2b   : > { %s2072_s25 = scalar_lea.vmem %s2071_s3, 32768  ;;  %p2073_p4 = scmp.lt.s32.totalorder %s2391_s8, %s2071_s3 }
  0x2c   : > { %p2068_p11 = pnand %p2066_p9, %p2052_p10  ;;  %p2074_p13 = scmp.lt.s32.totalorder %s2072_s25, %s2065_s29 }
  0x2e   : > { %p2069_p6 = pneg %p2068_p11  ;;  %p2075_p0 = por %p2074_p13, %p2073_p4 }
  0x30   : > { %p2076_p2 = pnand %p2075_p0, %p2069_p6 }
  0x32   : > { %2079 = shalt.err (!%p2076_p2)
}
  0x33   : > { %s2968_s4 = smov 256   ;;  %s2969_s5 = smov 16  }
  0x34   : > { %1922 = dma.hbm_to_vmem [thread:$0]  (!%p2387_p8), %s2383_s6, 16384, %s2391_s8, %s2393_s23, %s2968_s4, %s2968_s4, %s2969_s5  }
  0x35   : > { %p1802_p1 = scmp.ge.s32.totalorder %s2260_s22, 1  ;;  %p188_p4 = scmp.lt.s32.totalorder %s2260_s22, 7 }
  0x36   : > { %s1792_s29 = sadd.s32 4294967294, %s2260_s22   ;;  %s36_s30 = sadd.s32 1, %s2252_s20 }
  0x37   : > { %p2426_p6 = pnand %p1802_p1, %p188_p4  ;;  %s77_s3 = sadd.s32 1, %s2228_s14 }
  0x38   : > { %p38_p7 = scmp.ge.s32.totalorder %s36_s30, 3  ;;  %p84_p10 = scmp.ne.s32.totalorder %s2228_s14, %s2224_s13 }
  0x39   : > { %p90_p12 = scmp.ne.s32.totalorder %s2224_s13, %s2220_s12  ;;  %s105_s15 = sadd.s32 1, %s2216_s11 }
  0x3a   : > { %s3027_s30 = smov (%p38_p7, %s36_s30), 0  ;;  %s3029_s24 = smov (!%p38_p7, %s40_s24), %s2256_s21 }
  0x3b   : > { %2988 = sst [smem:[#allocation14_spill]] %s3027_s30  ;;  %s73_s6 = ssub.s32 %s2252_s20, %s3027_s30 }
  0x3c   : > { %p2989_p8 = scmp.eq.s32.totalorder %s2260_s22, 0  ;;  %p42_p9 = scmp.ge.s32.totalorder %s3029_s24, 2 }
  0x3d   : > { %p75_p11 = scmp.eq.s32.totalorder %s73_s6, 0  ;;  %p2453_p13 = por %p90_p12, %p2361_p3 }
  0x3e   : > { %p2447_p5 = por %p84_p10, %p2989_p8  ;;  %p115_p0 = scmp.ne.s32.totalorder %s2216_s11, %s2212_s10 }
  0x3f   : > { %s2991_s12 = scalar_select %p2453_p13, 1, 0 }
  0x40   : > { %s3031_s24 = smov (%p42_p9, %s3029_s24), 0  ;;  %p2994_p2 = scmp.ne.s32.totalorder %s2983_s27, 0 }
  0x41   : > { %2992 = sst [smem:[#allocation15_spill]] %s3031_s24  ;;  %s44_s25 = ssub.s32 %s2256_s21, %s3031_s24 }
  0x42   : > { %s2462_s23 = scalar_select %p75_p11, %s2228_s14, %s77_s3  }
  0x43   : > { %p2468_p1 = por %p2994_p2, %p115_p0  ;;  %p47_p4 = scmp.eq.s32.totalorder %s44_s25, 0 }
  0x44   : > { %2993 = sst [smem:[#allocation16_spill]] %s2462_s23  ;;  %s102_s26 = sor.u32 %s73_s6, %s44_s25 }
  0x45   : > { %s2995_s4 = scalar_select %p2468_p1, 1, 0 }
  0x46   : > { %p103_p3 = scmp.eq.s32.totalorder %s102_s26, 0  ;;  %p121_p7 = scmp.ne.s32.totalorder %s2212_s10, %s2208_s9 }
  0x47   : > { %2996 = sst [smem:[#allocation17_spill]] %s2995_s4  ;;  %s2997_s5 = sadd.s32 1, %s2240_s17 }
  0x48   : > { %s2477_s0 = scalar_select %p47_p4, %s2240_s17, %s2997_s5  }
  0x49   : > { %s2480_s30 = scalar_select %p103_p3, %s2216_s11, %s105_s15  }
  0x4a   : > { %p122_p10 = scmp.eq.s32.totalorder %s1792_s29, 5  ;;  %s166_s3 = sand.u32 1, %s2228_s14  }
  0x4b   : > { %s1799_s23 = sshll.u32 %s166_s3, 9  ;;  %s1815_s24 = sshll.u32 %s2252_s20, 8 }
  0x4c   : > { %p2483_p12 = por %p122_p10, %p121_p7  ;;  %s170_s21 = scalar_lea.vmem [#allocation6], %s1799_s23 }
  0x4d   : > { %s180_s2 = sshll.u32 %s170_s21, 4  ;;  %s2491_s6 = scalar_lea.hbm %s2963_s1, %s1815_s24  ;;  %s2493_s2 = int_to_ptr.vmem [resolvable:$true] %s180_s2 }
  0x4e   : > { %s2998_s27 = scalar_select %p2483_p12, 1, 0 }
  0x4f   : > { %p2999_p8 = scmp.lt.s32.totalorder %s2260_s22, 6  ;;  %s2503_s21 = scalar_lea.sflag [#allocation7], %s166_s3 }
  0x50   : > { %s2080_s29 = scalar_lea.hbm %s2491_s6, 8192  ;;  %s2085_s4 = scalar_lea.hbm %s2963_s1, 24576 }
  0x51   : > { %p2499_p9 = pnand %p2999_p8, %p2447_p5  ;;  %p2081_p11 = scmp.ne.s32.totalorder %s2491_s6, %s2080_s29 }
  0x52   : > { %p2086_p5 = scmp.lt.u32.totalorder %s2491_s6, %s2963_s1  ;;  %p2087_p3 = scmp.lt.u32.totalorder %s2085_s4, %s2080_s29 }
  0x53   : > { %p2082_p0 = pneg %p2499_p9  ;;  %p2089_p10 = scmp.lt.u32.totalorder %s2080_s29, %s2491_s6 }
  0x54   : > { %p2088_p7 = por %p2087_p3, %p2086_p5 }
  0x55   : > { %p2083_p2 = pnand %p2082_p0, %p2081_p11 }
  0x56   : > { %p2090_p8 = por %p2089_p10, %p2088_p7 }
  0x57   : > { %p2084_p4 = pneg %p2083_p2 }
  0x59   : > { %p2091_p12 = pnand %p2090_p8, %p2084_p4 }
  0x5b   : > { %2094 = shalt.err (!%p2091_p12)
}
  0x5c   : > { %s2095_s23 = scalar_lea.vmem %s2493_s2, 8192  ;;  %s2265_s25 = smov [#allocation6]  }
  0x5d   : > { %p2096_p11 = scmp.ne.s32.totalorder %s2493_s2, %s2095_s23  ;;  %s2100_s26 = sshll.u32 %s2265_s25, 4  ;;  %s2101_s26 = int_to_ptr.vmem [resolvable:$false] %s2100_s26 }
  0x5e   : > { %s2102_s3 = scalar_lea.vmem %s2101_s26, 16384  ;;  %p2103_p13 = scmp.lt.s32.totalorder %s2493_s2, %s2101_s26 }
  0x5f   : > { %p2098_p2 = pnand %p2096_p11, %p2082_p0  ;;  %p2104_p5 = scmp.lt.s32.totalorder %s2102_s3, %s2095_s23 }
  0x61   : > { %p2099_p1 = pneg %p2098_p2  ;;  %p2105_p3 = por %p2104_p5, %p2103_p13 }
  0x63   : > { %p2106_p7 = pnand %p2105_p3, %p2099_p1 }
  0x65   : > { %2109 = shalt.err (!%p2106_p7)
}
  0x66   : > { %s2266_s29 = smov 768   ;;  %s3001_s18 = smov 16  }
  0x67   : > { %s3002_s24 = smov 256   ;;  %192 = sbr.rel (%p2426_p6) target bundleno = 535 (0x217), region = 28 }
  0x68   : > { %1925 = dma.hbm_to_vmem [thread:$0]  (!%p2499_p9), %s2491_s6, 8192, %s2493_s2, %s2503_s21, %s2266_s29, %s3002_s24, %s3001_s18  }
  0x69   : > { %s194_s4 = sand.u32 (!%p2426_p6), 1, %s2236_s16   ;;  %p3003_p13 = scmp.ne.s32.totalorder (!%p2426_p6), %s2984_s28, 0 }
  0x6a   : > { %s1803_s15 = sshll.u32 (!%p2426_p6), %s194_s4, 10  ;;  %s195_s8 = scalar_lea.sflag (!%p2426_p6), [#allocation4], %s194_s4 }
  0x6b   : > { %s2536_s23 = scalar_lea.vmem (!%p2426_p6), [#allocation3], %s1803_s15 }
  0x6e   : > { %2195 = dma.done.wait (%p3003_p13), %s195_s8, 16384  }
  0x6f   : > { %2197 = vsyncadd (%p3003_p13), %s195_s8, 4294950912  ;;  %s203_s5 = sand.u32 1, %s2224_s13   ;;  %p3004_p6 = scmp.ne.s32.totalorder %s2991_s12, 0 }
  0x70   : > { %s1804_s25 = sshll.u32 %s203_s5, 9  ;;  %s204_s2 = scalar_lea.sflag [#allocation7], %s203_s5 }
  0x71   : > { %s2543_s6 = scalar_lea.vmem [#allocation6], %s1804_s25 }
  0x72   : > { %2199 = dma.done.wait (%p3004_p6), %s204_s2, 8192  }
  0x73   : > { %2201 = vsyncadd (%p3004_p6), %s204_s2, 4294959104  ;;  %v628_v0 = vld [vmem:[%s2543_s6 + $0x8] sm:$0xff]  ;;  %v630_v1 = vld [vmem:[%s2543_s6 + $0x18] sm:$0xff]  ;;  %s230_s28 = sand.u32 1, %s2212_s10   ;;  %s3005_s21 = sld [smem:[#allocation12_spill]] }
  0x74   : > { %v627_v2 = vld [vmem:[%s2543_s6] sm:$0xff]  ;;  %v1816_v3 = vpack.c.bf16 %v630_v1, %v628_v0  ;;  %v629_v4 = vld [vmem:[%s2543_s6 + $0x10] sm:$0xff]  ;;  %v632_v5 = vld [vmem:[%s2543_s6 + $0x28] sm:$0xff]  ;;  %s1805_s7 = sshll.u32 %s230_s28, 10  ;;  %s1912_s26 = smul.u32 384, %s2248_s19 }
  0x75   : > { %v634_v6 = vld [vmem:[%s2543_s6 + $0x38] sm:$0xff]  ;;  %v1818_v7 = vpack.c.bf16 %v629_v4, %v627_v2  ;;  %v631_v9 = vld [vmem:[%s2543_s6 + $0x20] sm:$0xff]  ;;  %v633_v10 = vld [vmem:[%s2543_s6 + $0x30] sm:$0xff]  ;;  %s2744_s12 = scalar_lea.vmem [#allocation8], %s1805_s7  ;;  %s3006_s24 = sld [smem:[#allocation17_spill]] }
  0x76   : > { %v1820_v8 = vpack.c.bf16 %v634_v6, %v632_v5  ;;  %v636_v11 = vld [vmem:[%s2543_s6 + $0x48] sm:$0xff]  ;;  %1817 = vmatprep.subr.bf16.mxu0 %v1816_v3  ;;  %1880 = vmatprep.subr.bf16.mxu1 %v1816_v3  ;;  %v638_v12 = vld [vmem:[%s2543_s6 + $0x58] sm:$0xff]  ;;  %v1822_v13 = vpack.c.bf16 %v633_v10, %v631_v9  ;;  %v635_v15 = vld [vmem:[%s2543_s6 + $0x40] sm:$0xff]  ;;  %s1672_s18 = sshll.u32 %s2744_s12, 4  ;;  %s3007_s8 = sld [smem:[#allocation19_spill]]  ;;  %s2878_s18 = int_to_ptr.vmem [resolvable:$true] %s1672_s18 }
  0x77   : > { %1819 = vmatpush1.bf16.msra.mxu0 %v1818_v7  ;;  %1896 = vmatpush1.bf16.msra.mxu1 %v1818_v7  ;;  %v1824_v14 = vpack.c.bf16 %v638_v12, %v636_v11  ;;  %v637_v16 = vld [vmem:[%s2543_s6 + $0x50] sm:$0xff]  ;;  %v640_v17 = vld [vmem:[%s2543_s6 + $0x68] sm:$0xff]  ;;  %v642_v18 = vld [vmem:[%s2543_s6 + $0x78] sm:$0xff]  ;;  %s2886_s5 = scalar_lea.sflag [#allocation5], %s230_s28  ;;  %s2110_s25 = scalar_lea.vmem %s2878_s18, 16384 }
  0x78   : > { %1821 = vmatprep.subr.bf16.mxu0 %v1820_v8  ;;  %1881 = vmatprep.subr.bf16.mxu1 %v1820_v8  ;;  %v1826_v19 = vpack.c.bf16 %v637_v16, %v635_v15  ;;  %v1828_v20 = vpack.c.bf16 %v642_v18, %v640_v17  ;;  %v639_v21 = vld [vmem:[%s2543_s6 + $0x60] sm:$0xff]  ;;  %v641_v22 = vld [vmem:[%s2543_s6 + $0x70] sm:$0xff]  ;;  %v644_v23 = vld [vmem:[%s2543_s6 + $0x88] sm:$0xff]  ;;  %p2111_p1 = scmp.ne.s32.totalorder %s2878_s18, %s2110_s25  ;;  %s2267_s2 = smov [#allocation8]  }
  0x79   : > { %v646_v24 = vld [vmem:[%s2543_s6 + $0x98] sm:$0xff]  ;;  %v1830_v25 = vpack.c.bf16 %v641_v22, %v639_v21  ;;  %v643_v27 = vld [vmem:[%s2543_s6 + $0x80] sm:$0xff]  ;;  %v645_v28 = vld [vmem:[%s2543_s6 + $0x90] sm:$0xff]  ;;  %s1808_s3 = sshll.u32 %s3005_s21, 1 }
  0x7a   : > { %v1832_v26 = vpack.c.bf16 %v646_v24, %v644_v23  ;;  %v648_v29 = vld [vmem:[%s2543_s6 + $0xa8] sm:$0xff]  ;;  %v650_v30 = vld [vmem:[%s2543_s6 + $0xb8] sm:$0xff]  ;;  %v1834_v31 = vpack.c.bf16 %v645_v28, %v643_v27  ;;  %v647_v33 = vld [vmem:[%s2543_s6 + $0xa0] sm:$0xff]  ;;  %s1669_s29 = sadd.s32 %s1912_s26, %s1808_s3 }
  0x7b   : > { %1823 = vmatpush1.bf16.msra.mxu0 %v1822_v13  ;;  %1897 = vmatpush1.bf16.msra.mxu1 %v1822_v13  ;;  %v1836_v32 = vpack.c.bf16 %v650_v30, %v648_v29  ;;  %v649_v34 = vld [vmem:[%s2543_s6 + $0xb0] sm:$0xff]  ;;  %v652_v35 = vld [vmem:[%s2543_s6 + $0xc8] sm:$0xff]  ;;  %v654_v36 = vld [vmem:[%s2543_s6 + $0xd8] sm:$0xff]  ;;  %s1810_s19 = sshll.u32 %s1669_s29, 7  ;;  %p3008_p12 = scmp.ne.s32.totalorder %s3006_s24, 0 }
  0x7c   : > { %1825 = vmatprep.subr.bf16.mxu0 %v1824_v14  ;;  %1882 = vmatprep.subr.bf16.mxu1 %v1824_v14  ;;  %v1838_v37 = vpack.c.bf16 %v649_v34, %v647_v33  ;;  %v651_v38 = vld [vmem:[%s2543_s6 + $0xc0] sm:$0xff]  ;;  %v1840_v39 = vpack.c.bf16 %v654_v36, %v652_v35  ;;  %v653_v40 = vld [vmem:[%s2543_s6 + $0xd0] sm:$0xff]  ;;  %v500_v41 = vld [vmem:[%s2536_s23 + $0x8] sm:$0xff] }
  0x7d   : > { %v564_v42 = vld [vmem:[%s2536_s23 + $0x208] sm:$0xff]  ;;  %v658_v44 = vld [vmem:[%s2543_s6 + $0xf8] sm:$0xff]  ;;  %755 = vmatprep.mubr.f32.mxu0 %v500_v41  ;;  %v1842_v45 = vpack.c.bf16 %v653_v40, %v651_v38  ;;  %v655_v47 = vld [vmem:[%s2543_s6 + $0xe0] sm:$0xff]  ;;  %p2112_p9 = pnand %p2111_p1, %p3008_p12 }
  0x7e   : > { %v656_v43 = vld [vmem:[%s2543_s6 + $0xe8] sm:$0xff]  ;;  %947 = vmatprep.mubr.f32.mxu1 %v564_v42  ;;  %v657_v48 = vld [vmem:[%s2543_s6 + $0xf0] sm:$0xff]  ;;  %v662_v50 = vld [vmem:[%s2543_s6 + $0x118] sm:$0xff] }
  0x7f   : > { %1827 = vmatpush1.bf16.msra.mxu0 %v1826_v19  ;;  %1898 = vmatpush1.bf16.msra.mxu1 %v1826_v19  ;;  %v1844_v46 = vpack.c.bf16 %v658_v44, %v656_v43  ;;  %v660_v49 = vld [vmem:[%s2543_s6 + $0x108] sm:$0xff]  ;;  %v1846_v51 = vpack.c.bf16 %v657_v48, %v655_v47  ;;  %v659_v53 = vld [vmem:[%s2543_s6 + $0x100] sm:$0xff]  ;;  %v661_v54 = vld [vmem:[%s2543_s6 + $0x110] sm:$0xff]  ;;  %p2113_p0 = pneg %p2112_p9 }
  0x80   : > { %1829 = vmatprep.subr.bf16.mxu0 %v1828_v20  ;;  %1883 = vmatprep.subr.bf16.mxu1 %v1828_v20  ;;  %v1848_v52 = vpack.c.bf16 %v662_v50, %v660_v49  ;;  %v664_v55 = vld [vmem:[%s2543_s6 + $0x128] sm:$0xff]  ;;  %v666_v56 = vld [vmem:[%s2543_s6 + $0x138] sm:$0xff]  ;;  %v1850_v57 = vpack.c.bf16 %v661_v54, %v659_v53  ;;  %v663_v59 = vld [vmem:[%s2543_s6 + $0x120] sm:$0xff] }
  0x81   : > { %v1852_v58 = vpack.c.bf16 %v666_v56, %v664_v55  ;;  %v665_v60 = vld [vmem:[%s2543_s6 + $0x130] sm:$0xff]  ;;  %v668_v61 = vld [vmem:[%s2543_s6 + $0x148] sm:$0xff]  ;;  %v670_v62 = vld [vmem:[%s2543_s6 + $0x158] sm:$0xff] }
  0x82   : > { %v1854_v63 = vpack.c.bf16 %v665_v60, %v663_v59  ;;  %v1856_v0 = vpack.c.bf16 %v670_v62, %v668_v61  ;;  %v667_v1 = vld [vmem:[%s2543_s6 + $0x140] sm:$0xff]  ;;  %v669_v2 = vld [vmem:[%s2543_s6 + $0x150] sm:$0xff]  ;;  %v672_v3 = vld [vmem:[%s2543_s6 + $0x168] sm:$0xff] }
  0x83   : > { %1831 = vmatpush1.bf16.msra.mxu0 %v1830_v25  ;;  %1899 = vmatpush1.bf16.msra.mxu1 %v1830_v25  ;;  %v674_v4 = vld [vmem:[%s2543_s6 + $0x178] sm:$0xff]  ;;  %v1858_v5 = vpack.c.bf16 %v669_v2, %v667_v1  ;;  %v671_v7 = vld [vmem:[%s2543_s6 + $0x160] sm:$0xff]  ;;  %v673_v8 = vld [vmem:[%s2543_s6 + $0x170] sm:$0xff] }
  0x84   : > { %1833 = vmatprep.subr.bf16.mxu0 %v1832_v26  ;;  %1884 = vmatprep.subr.bf16.mxu1 %v1832_v26  ;;  %v1860_v6 = vpack.c.bf16 %v674_v4, %v672_v3  ;;  %v676_v9 = vld [vmem:[%s2543_s6 + $0x188] sm:$0xff]  ;;  %v678_v10 = vld [vmem:[%s2543_s6 + $0x198] sm:$0xff]  ;;  %v1862_v11 = vpack.c.bf16 %v673_v8, %v671_v7  ;;  %v675_v13 = vld [vmem:[%s2543_s6 + $0x180] sm:$0xff] }
  0x85   : > { %v1864_v12 = vpack.c.bf16 %v678_v10, %v676_v9  ;;  %v677_v14 = vld [vmem:[%s2543_s6 + $0x190] sm:$0xff]  ;;  %v680_v15 = vld [vmem:[%s2543_s6 + $0x1a8] sm:$0xff]  ;;  %v682_v16 = vld [vmem:[%s2543_s6 + $0x1b8] sm:$0xff] }
  0x86   : > { %v1866_v17 = vpack.c.bf16 %v677_v14, %v675_v13  ;;  %v1868_v18 = vpack.c.bf16 %v682_v16, %v680_v15  ;;  %v679_v19 = vld [vmem:[%s2543_s6 + $0x1a0] sm:$0xff]  ;;  %v681_v20 = vld [vmem:[%s2543_s6 + $0x1b0] sm:$0xff]  ;;  %v684_v21 = vld [vmem:[%s2543_s6 + $0x1c8] sm:$0xff] }
  0x87   : > { %1835 = vmatpush1.bf16.msra.mxu0 %v1834_v31  ;;  %1900 = vmatpush1.bf16.msra.mxu1 %v1834_v31  ;;  %v686_v22 = vld [vmem:[%s2543_s6 + $0x1d8] sm:$0xff]  ;;  %v1870_v23 = vpack.c.bf16 %v681_v20, %v679_v19  ;;  %v683_v25 = vld [vmem:[%s2543_s6 + $0x1c0] sm:$0xff]  ;;  %v685_v26 = vld [vmem:[%s2543_s6 + $0x1d0] sm:$0xff] }
  0x88   : > { %1837 = vmatprep.subr.bf16.mxu0 %v1836_v32  ;;  %1885 = vmatprep.subr.bf16.mxu1 %v1836_v32  ;;  %v1872_v24 = vpack.c.bf16 %v686_v22, %v684_v21  ;;  %v688_v27 = vld [vmem:[%s2543_s6 + $0x1e8] sm:$0xff]  ;;  %v690_v28 = vld [vmem:[%s2543_s6 + $0x1f8] sm:$0xff]  ;;  %v1874_v29 = vpack.c.bf16 %v685_v26, %v683_v25  ;;  %v687_v31 = vld [vmem:[%s2543_s6 + $0x1e0] sm:$0xff] }
  0x89   : > { %v1876_v30 = vpack.c.bf16 %v690_v28, %v688_v27  ;;  %v689_v32 = vld [vmem:[%s2543_s6 + $0x1f0] sm:$0xff]  ;;  %v499_v34 = vld [vmem:[%s2536_s23] sm:$0xff]  ;;  %v502_v36 = vld [vmem:[%s2536_s23 + $0x18] sm:$0xff]  ;;  %s2114_s6 = sshll.u32 %s2267_s2, 4  ;;  %s2115_s6 = int_to_ptr.vmem [resolvable:$false] %s2114_s6 }
  0x8a   : > { %v1878_v33 = vpack.c.bf16 %v689_v32, %v687_v31  ;;  %v563_v35 = vld [vmem:[%s2536_s23 + $0x200] sm:$0xff]  ;;  %v501_v38 = vld [vmem:[%s2536_s23 + $0x10] sm:$0xff]  ;;  %v504_v40 = vld [vmem:[%s2536_s23 + $0x28] sm:$0xff]  ;;  %s2116_s7 = scalar_lea.vmem %s2115_s6, 32768  ;;  %p2117_p4 = scmp.lt.s32.totalorder %s2878_s18, %s2115_s6 }
  0x8b   : > { %1839 = vmatpush1.bf16.msra.mxu0 %v1838_v37  ;;  %1901 = vmatpush1.bf16.msra.mxu1 %v1838_v37  ;;  %v566_v37 = vld [vmem:[%s2536_s23 + $0x218] sm:$0xff]  ;;  %v568_v41 = vld [vmem:[%s2536_s23 + $0x228] sm:$0xff]  ;;  %v503_v42 = vld [vmem:[%s2536_s23 + $0x20] sm:$0xff]  ;;  %p2118_p10 = scmp.lt.s32.totalorder %s2116_s7, %s2110_s25 }
  0x8c   : > { %1841 = vmatprep.subr.bf16.mxu0 %v1840_v39  ;;  %1886 = vmatprep.subr.bf16.mxu1 %v1840_v39  ;;  %v565_v39 = vld [vmem:[%s2536_s23 + $0x210] sm:$0xff]  ;;  %v567_v43 = vld [vmem:[%s2536_s23 + $0x220] sm:$0xff]  ;;  %v506_v44 = vld [vmem:[%s2536_s23 + $0x38] sm:$0xff] }
  0x8d   : > { %v569_v47 = vld [vmem:[%s2536_s23 + $0x230] sm:$0xff]  ;;  %v508_v48 = vld [vmem:[%s2536_s23 + $0x48] sm:$0xff]  ;;  %v507_v50 = vld [vmem:[%s2536_s23 + $0x40] sm:$0xff]  ;;  %p2119_p8 = por %p2118_p10, %p2117_p4 }
  0x8e   : > { %v572_v49 = vld [vmem:[%s2536_s23 + $0x248] sm:$0xff]  ;;  %v574_v53 = vld [vmem:[%s2536_s23 + $0x258] sm:$0xff]  ;;  %v509_v54 = vld [vmem:[%s2536_s23 + $0x50] sm:$0xff] }
  0x8f   : > { %1843 = vmatpush1.bf16.msra.mxu0 %v1842_v45  ;;  %1902 = vmatpush1.bf16.msra.mxu1 %v1842_v45  ;;  %v570_v45 = vld [vmem:[%s2536_s23 + $0x238] sm:$0xff]  ;;  %v573_v55 = vld [vmem:[%s2536_s23 + $0x250] sm:$0xff]  ;;  %v512_v56 = vld [vmem:[%s2536_s23 + $0x68] sm:$0xff]  ;;  %p2120_p11 = pnand %p2119_p8, %p2113_p0 }
  0x90   : > { %1845 = vmatprep.subr.bf16.mxu0 %v1844_v46  ;;  %1887 = vmatprep.subr.bf16.mxu1 %v1844_v46  ;;  %v505_v46 = vld [vmem:[%s2536_s23 + $0x30] sm:$0xff]  ;;  %v575_v59 = vld [vmem:[%s2536_s23 + $0x260] sm:$0xff]  ;;  %v514_v60 = vld [vmem:[%s2536_s23 + $0x78] sm:$0xff] }
  0x91   : > { %v578_v61 = vld [vmem:[%s2536_s23 + $0x278] sm:$0xff]  ;;  %v513_v62 = vld [vmem:[%s2536_s23 + $0x70] sm:$0xff]  ;;  %v580_v1 = vld [vmem:[%s2536_s23 + $0x288] sm:$0xff] }
  0x92   : > { %v515_v2 = vld [vmem:[%s2536_s23 + $0x80] sm:$0xff]  ;;  %v518_v4 = vld [vmem:[%s2536_s23 + $0x98] sm:$0xff]  ;;  %v581_v7 = vld [vmem:[%s2536_s23 + $0x290] sm:$0xff] }
  0x93   : > { %1847 = vmatpush1.bf16.msra.mxu0 %v1846_v51  ;;  %1903 = vmatpush1.bf16.msra.mxu1 %v1846_v51  ;;  %v571_v51 = vld [vmem:[%s2536_s23 + $0x240] sm:$0xff]  ;;  %v520_v8 = vld [vmem:[%s2536_s23 + $0xa8] sm:$0xff]  ;;  %v586_v13 = vld [vmem:[%s2536_s23 + $0x2b8] sm:$0xff] }
  0x94   : > { %1849 = vmatprep.subr.bf16.mxu0 %v1848_v52  ;;  %1888 = vmatprep.subr.bf16.mxu1 %v1848_v52  ;;  %v510_v52 = vld [vmem:[%s2536_s23 + $0x58] sm:$0xff]  ;;  %v579_v3 = vld [vmem:[%s2536_s23 + $0x280] sm:$0xff]  ;;  %v584_v9 = vld [vmem:[%s2536_s23 + $0x2a8] sm:$0xff] }
  0x95   : > { %v519_v10 = vld [vmem:[%s2536_s23 + $0xa0] sm:$0xff]  ;;  %v521_v14 = vld [vmem:[%s2536_s23 + $0xb0] sm:$0xff]  ;;  %v524_v16 = vld [vmem:[%s2536_s23 + $0xc8] sm:$0xff] }
  0x96   : > { %v585_v15 = vld [vmem:[%s2536_s23 + $0x2b0] sm:$0xff]  ;;  %v587_v19 = vld [vmem:[%s2536_s23 + $0x2c0] sm:$0xff]  ;;  %v526_v20 = vld [vmem:[%s2536_s23 + $0xd8] sm:$0xff] }
  0x97   : > { %1851 = vmatpush1.bf16.msra.mxu0 %v1850_v57  ;;  %1904 = vmatpush1.bf16.msra.mxu1 %v1850_v57  ;;  %v576_v57 = vld [vmem:[%s2536_s23 + $0x268] sm:$0xff]  ;;  %v590_v21 = vld [vmem:[%s2536_s23 + $0x2d8] sm:$0xff]  ;;  %v525_v22 = vld [vmem:[%s2536_s23 + $0xd0] sm:$0xff] }
  0x98   : > { %1853 = vmatprep.subr.bf16.mxu0 %v1852_v58  ;;  %1889 = vmatprep.subr.bf16.mxu1 %v1852_v58  ;;  %v511_v58 = vld [vmem:[%s2536_s23 + $0x60] sm:$0xff]  ;;  %v592_v25 = vld [vmem:[%s2536_s23 + $0x2e8] sm:$0xff]  ;;  %v530_v28 = vld [vmem:[%s2536_s23 + $0xf8] sm:$0xff] }
  0x99   : > { %v527_v26 = vld [vmem:[%s2536_s23 + $0xe0] sm:$0xff]  ;;  %v593_v31 = vld [vmem:[%s2536_s23 + $0x2f0] sm:$0xff]  ;;  %v532_v32 = vld [vmem:[%s2536_s23 + $0x108] sm:$0xff] }
  0x9a   : > { %v591_v27 = vld [vmem:[%s2536_s23 + $0x2e0] sm:$0xff] }
  0x9b   : > { %1855 = vmatpush1.bf16.msra.mxu0 %v1854_v63  ;;  %1905 = vmatpush1.bf16.msra.mxu1 %v1854_v63  ;;  %v577_v63 = vld [vmem:[%s2536_s23 + $0x270] sm:$0xff] }
  0x9c   : > { %1857 = vmatprep.subr.bf16.mxu0 %v1856_v0  ;;  %1890 = vmatprep.subr.bf16.mxu1 %v1856_v0  ;;  %v516_v0 = vld [vmem:[%s2536_s23 + $0x88] sm:$0xff] }
  0x9f   : > { %1859 = vmatpush1.bf16.msra.mxu0 %v1858_v5  ;;  %1906 = vmatpush1.bf16.msra.mxu1 %v1858_v5  ;;  %v582_v5 = vld [vmem:[%s2536_s23 + $0x298] sm:$0xff] }
  0xa0   : > { %1861 = vmatprep.subr.bf16.mxu0 %v1860_v6  ;;  %1891 = vmatprep.subr.bf16.mxu1 %v1860_v6  ;;  %v517_v6 = vld [vmem:[%s2536_s23 + $0x90] sm:$0xff] }
  0xa3   : > { %1863 = vmatpush1.bf16.msra.mxu0 %v1862_v11  ;;  %1907 = vmatpush1.bf16.msra.mxu1 %v1862_v11  ;;  %v583_v11 = vld [vmem:[%s2536_s23 + $0x2a0] sm:$0xff] }
  0xa4   : > { %1865 = vmatprep.subr.bf16.mxu0 %v1864_v12  ;;  %1892 = vmatprep.subr.bf16.mxu1 %v1864_v12  ;;  %v522_v12 = vld [vmem:[%s2536_s23 + $0xb8] sm:$0xff] }
  0xa7   : > { %1867 = vmatpush1.bf16.msra.mxu0 %v1866_v17  ;;  %1908 = vmatpush1.bf16.msra.mxu1 %v1866_v17  ;;  %v588_v17 = vld [vmem:[%s2536_s23 + $0x2c8] sm:$0xff] }
  0xa8   : > { %1869 = vmatprep.subr.bf16.mxu0 %v1868_v18  ;;  %1893 = vmatprep.subr.bf16.mxu1 %v1868_v18  ;;  %v523_v18 = vld [vmem:[%s2536_s23 + $0xc0] sm:$0xff] }
  0xab   : > { %1871 = vmatpush1.bf16.msra.mxu0 %v1870_v23  ;;  %1909 = vmatpush1.bf16.msra.mxu1 %v1870_v23  ;;  %v589_v23 = vld [vmem:[%s2536_s23 + $0x2d0] sm:$0xff] }
  0xac   : > { %1873 = vmatprep.subr.bf16.mxu0 %v1872_v24  ;;  %1894 = vmatprep.subr.bf16.mxu1 %v1872_v24  ;;  %v528_v24 = vld [vmem:[%s2536_s23 + $0xe8] sm:$0xff] }
  0xaf   : > { %1875 = vmatpush1.bf16.msra.mxu0 %v1874_v29  ;;  %1910 = vmatpush1.bf16.msra.mxu1 %v1874_v29  ;;  %v594_v29 = vld [vmem:[%s2536_s23 + $0x2f8] sm:$0xff] }
  0xb0   : > { %1877 = vmatprep.subr.bf16.mxu0 %v1876_v30  ;;  %1895 = vmatprep.subr.bf16.mxu1 %v1876_v30  ;;  %v529_v30 = vld [vmem:[%s2536_s23 + $0xf0] sm:$0xff] }
  0xb3   : > { %1879 = vmatpush1.bf16.msra.mxu0 %v1878_v33  ;;  %1911 = vmatpush1.bf16.msra.mxu1 %v1878_v33  ;;  %v596_v33 = vld [vmem:[%s2536_s23 + $0x308] sm:$0xff] }
  0xb6   : > { %756 = vmatmul.mubr.f32.vlgmr.msra.gmra.mrb[0].mxu0 %v499_v34  ;;  %948 = vmatmul.mubr.f32.vlgmr.msra.gmra.mrb[0].mxu1 %v563_v35  ;;  %v531_v34 = vld [vmem:[%s2536_s23 + $0x100] sm:$0xff] }
  0xb7   : > { %761 = vmatprep.mubr.f32.mxu0 %v502_v36  ;;  %953 = vmatprep.mubr.f32.mxu1 %v566_v37  ;;  %v595_v35 = vld [vmem:[%s2536_s23 + $0x300] sm:$0xff]  ;;  %v534_v36 = vld [vmem:[%s2536_s23 + $0x118] sm:$0xff] }
  0xb8   : > { %v598_v37 = vld [vmem:[%s2536_s23 + $0x318] sm:$0xff] }
  0xba   : > { %762 = vmatmul.mubr.f32.gmra.mrb[2].mxu0 %v501_v38  ;;  %954 = vmatmul.mubr.f32.gmra.mrb[2].mxu1 %v565_v39  ;;  %v533_v38 = vld [vmem:[%s2536_s23 + $0x110] sm:$0xff] }
  0xbb   : > { %767 = vmatprep.mubr.f32.mxu0 %v504_v40  ;;  %959 = vmatprep.mubr.f32.mxu1 %v568_v41  ;;  %v597_v39 = vld [vmem:[%s2536_s23 + $0x310] sm:$0xff]  ;;  %v536_v40 = vld [vmem:[%s2536_s23 + $0x128] sm:$0xff] }
  0xbc   : > { %v600_v41 = vld [vmem:[%s2536_s23 + $0x328] sm:$0xff] }
  0xbe   : > { %768 = vmatmul.mubr.f32.gmra.mrb[4].mxu0 %v503_v42  ;;  %960 = vmatmul.mubr.f32.gmra.mrb[4].mxu1 %v567_v43  ;;  %v535_v42 = vld [vmem:[%s2536_s23 + $0x120] sm:$0xff] }
  0xbf   : > { %773 = vmatprep.mubr.f32.mxu0 %v506_v44  ;;  %965 = vmatprep.mubr.f32.mxu1 %v570_v45  ;;  %v599_v43 = vld [vmem:[%s2536_s23 + $0x320] sm:$0xff]  ;;  %v538_v44 = vld [vmem:[%s2536_s23 + $0x138] sm:$0xff] }
  0xc0   : > { %v602_v45 = vld [vmem:[%s2536_s23 + $0x338] sm:$0xff] }
  0xc2   : > { %774 = vmatmul.mubr.f32.gmra.mrb[6].mxu0 %v505_v46  ;;  %966 = vmatmul.mubr.f32.gmra.mrb[6].mxu1 %v569_v47  ;;  %v537_v46 = vld [vmem:[%s2536_s23 + $0x130] sm:$0xff] }
  0xc3   : > { %779 = vmatprep.mubr.f32.mxu0 %v508_v48  ;;  %971 = vmatprep.mubr.f32.mxu1 %v572_v49  ;;  %v601_v47 = vld [vmem:[%s2536_s23 + $0x330] sm:$0xff]  ;;  %v540_v48 = vld [vmem:[%s2536_s23 + $0x148] sm:$0xff] }
  0xc4   : > { %v604_v49 = vld [vmem:[%s2536_s23 + $0x348] sm:$0xff] }
  0xc6   : > { %780 = vmatmul.mubr.f32.gmra.mrb[8].mxu0 %v507_v50  ;;  %972 = vmatmul.mubr.f32.gmra.mrb[8].mxu1 %v571_v51  ;;  %v539_v50 = vld [vmem:[%s2536_s23 + $0x140] sm:$0xff] }
  0xc7   : > { %785 = vmatprep.mubr.f32.mxu0 %v510_v52  ;;  %977 = vmatprep.mubr.f32.mxu1 %v574_v53  ;;  %v603_v51 = vld [vmem:[%s2536_s23 + $0x340] sm:$0xff]  ;;  %v542_v52 = vld [vmem:[%s2536_s23 + $0x158] sm:$0xff] }
  0xc8   : > { %v606_v53 = vld [vmem:[%s2536_s23 + $0x358] sm:$0xff] }
  0xca   : > { %786 = vmatmul.mubr.f32.gmra.mrb[10].mxu0 %v509_v54  ;;  %978 = vmatmul.mubr.f32.gmra.mrb[10].mxu1 %v573_v55  ;;  %v541_v54 = vld [vmem:[%s2536_s23 + $0x150] sm:$0xff] }
  0xcb   : > { %791 = vmatprep.mubr.f32.mxu0 %v512_v56  ;;  %983 = vmatprep.mubr.f32.mxu1 %v576_v57  ;;  %v605_v55 = vld [vmem:[%s2536_s23 + $0x350] sm:$0xff]  ;;  %v544_v56 = vld [vmem:[%s2536_s23 + $0x168] sm:$0xff] }
  0xcc   : > { %v608_v57 = vld [vmem:[%s2536_s23 + $0x368] sm:$0xff] }
  0xce   : > { %792 = vmatmul.mubr.f32.gmra.mrb[12].mxu0 %v511_v58  ;;  %984 = vmatmul.mubr.f32.gmra.mrb[12].mxu1 %v575_v59  ;;  %v543_v58 = vld [vmem:[%s2536_s23 + $0x160] sm:$0xff] }
  0xcf   : > { %797 = vmatprep.mubr.f32.mxu0 %v514_v60  ;;  %989 = vmatprep.mubr.f32.mxu1 %v578_v61  ;;  %v607_v59 = vld [vmem:[%s2536_s23 + $0x360] sm:$0xff]  ;;  %v546_v60 = vld [vmem:[%s2536_s23 + $0x178] sm:$0xff] }
  0xd0   : > { %v610_v61 = vld [vmem:[%s2536_s23 + $0x378] sm:$0xff] }
  0xd2   : > { %798 = vmatmul.mubr.f32.gmra.mrb[14].mxu0 %v513_v62  ;;  %990 = vmatmul.mubr.f32.gmra.mrb[14].mxu1 %v577_v63  ;;  %v545_v62 = vld [vmem:[%s2536_s23 + $0x170] sm:$0xff] }
  0xd3   : > { %803 = vmatprep.mubr.f32.mxu0 %v516_v0  ;;  %995 = vmatprep.mubr.f32.mxu1 %v580_v1  ;;  %v609_v63 = vld [vmem:[%s2536_s23 + $0x370] sm:$0xff]  ;;  %v548_v0 = vld [vmem:[%s2536_s23 + $0x188] sm:$0xff] }
  0xd4   : > { %v612_v1 = vld [vmem:[%s2536_s23 + $0x388] sm:$0xff] }
  0xd6   : > { %804 = vmatmul.mubr.f32.gmra.mrb[16].mxu0 %v515_v2  ;;  %996 = vmatmul.mubr.f32.gmra.mrb[16].mxu1 %v579_v3  ;;  %v547_v2 = vld [vmem:[%s2536_s23 + $0x180] sm:$0xff] }
  0xd7   : > { %809 = vmatprep.mubr.f32.mxu0 %v518_v4  ;;  %1001 = vmatprep.mubr.f32.mxu1 %v582_v5  ;;  %v611_v3 = vld [vmem:[%s2536_s23 + $0x380] sm:$0xff]  ;;  %v550_v4 = vld [vmem:[%s2536_s23 + $0x198] sm:$0xff] }
  0xd8   : > { %v614_v5 = vld [vmem:[%s2536_s23 + $0x398] sm:$0xff] }
  0xda   : > { %810 = vmatmul.mubr.f32.gmra.mrb[18].mxu0 %v517_v6  ;;  %1002 = vmatmul.mubr.f32.gmra.mrb[18].mxu1 %v581_v7  ;;  %v549_v6 = vld [vmem:[%s2536_s23 + $0x190] sm:$0xff] }
  0xdb   : > { %815 = vmatprep.mubr.f32.mxu0 %v520_v8  ;;  %1007 = vmatprep.mubr.f32.mxu1 %v584_v9  ;;  %v613_v7 = vld [vmem:[%s2536_s23 + $0x390] sm:$0xff]  ;;  %v552_v8 = vld [vmem:[%s2536_s23 + $0x1a8] sm:$0xff] }
  0xdc   : > { %v616_v9 = vld [vmem:[%s2536_s23 + $0x3a8] sm:$0xff] }
  0xde   : > { %816 = vmatmul.mubr.f32.gmra.mrb[20].mxu0 %v519_v10  ;;  %1008 = vmatmul.mubr.f32.gmra.mrb[20].mxu1 %v583_v11  ;;  %v551_v10 = vld [vmem:[%s2536_s23 + $0x1a0] sm:$0xff] }
  0xdf   : > { %821 = vmatprep.mubr.f32.mxu0 %v522_v12  ;;  %1013 = vmatprep.mubr.f32.mxu1 %v586_v13  ;;  %v615_v11 = vld [vmem:[%s2536_s23 + $0x3a0] sm:$0xff]  ;;  %v554_v12 = vld [vmem:[%s2536_s23 + $0x1b8] sm:$0xff] }
  0xe0   : > { %v618_v13 = vld [vmem:[%s2536_s23 + $0x3b8] sm:$0xff] }
  0xe2   : > { %822 = vmatmul.mubr.f32.gmra.mrb[22].mxu0 %v521_v14  ;;  %1014 = vmatmul.mubr.f32.gmra.mrb[22].mxu1 %v585_v15  ;;  %v553_v14 = vld [vmem:[%s2536_s23 + $0x1b0] sm:$0xff] }
  0xe3   : > { %827 = vmatprep.mubr.f32.mxu0 %v524_v16  ;;  %1019 = vmatprep.mubr.f32.mxu1 %v588_v17  ;;  %v617_v15 = vld [vmem:[%s2536_s23 + $0x3b0] sm:$0xff]  ;;  %v556_v16 = vld [vmem:[%s2536_s23 + $0x1c8] sm:$0xff] }
  0xe4   : > { %v620_v17 = vld [vmem:[%s2536_s23 + $0x3c8] sm:$0xff] }
  0xe6   : > { %828 = vmatmul.mubr.f32.gmra.mrb[24].mxu0 %v523_v18  ;;  %1020 = vmatmul.mubr.f32.gmra.mrb[24].mxu1 %v587_v19  ;;  %v555_v18 = vld [vmem:[%s2536_s23 + $0x1c0] sm:$0xff] }
  0xe7   : > { %833 = vmatprep.mubr.f32.mxu0 %v526_v20  ;;  %1025 = vmatprep.mubr.f32.mxu1 %v590_v21  ;;  %v619_v19 = vld [vmem:[%s2536_s23 + $0x3c0] sm:$0xff]  ;;  %v558_v20 = vld [vmem:[%s2536_s23 + $0x1d8] sm:$0xff] }
  0xe8   : > { %v622_v21 = vld [vmem:[%s2536_s23 + $0x3d8] sm:$0xff] }
  0xea   : > { %834 = vmatmul.mubr.f32.gmra.mrb[26].mxu0 %v525_v22  ;;  %1026 = vmatmul.mubr.f32.gmra.mrb[26].mxu1 %v589_v23  ;;  %v557_v22 = vld [vmem:[%s2536_s23 + $0x1d0] sm:$0xff] }
  0xeb   : > { %839 = vmatprep.mubr.f32.mxu0 %v528_v24  ;;  %1031 = vmatprep.mubr.f32.mxu1 %v592_v25  ;;  %v621_v23 = vld [vmem:[%s2536_s23 + $0x3d0] sm:$0xff]  ;;  %v560_v24 = vld [vmem:[%s2536_s23 + $0x1e8] sm:$0xff] }
  0xec   : > { %v624_v25 = vld [vmem:[%s2536_s23 + $0x3e8] sm:$0xff] }
  0xee   : > { %840 = vmatmul.mubr.f32.gmra.mrb[28].mxu0 %v527_v26  ;;  %1032 = vmatmul.mubr.f32.gmra.mrb[28].mxu1 %v591_v27  ;;  %v559_v26 = vld [vmem:[%s2536_s23 + $0x1e0] sm:$0xff] }
  0xef   : > { %845 = vmatprep.mubr.f32.mxu0 %v530_v28  ;;  %1037 = vmatprep.mubr.f32.mxu1 %v594_v29  ;;  %v623_v27 = vld [vmem:[%s2536_s23 + $0x3e0] sm:$0xff]  ;;  %v562_v28 = vld [vmem:[%s2536_s23 + $0x1f8] sm:$0xff] }
  0xf0   : > { %v626_v29 = vld [vmem:[%s2536_s23 + $0x3f8] sm:$0xff] }
  0xf2   : > { %846 = vmatmul.mubr.f32.gmra.mrb[30].mxu0 %v529_v30  ;;  %1038 = vmatmul.mubr.f32.gmra.mrb[30].mxu1 %v593_v31  ;;  %v561_v30 = vld [vmem:[%s2536_s23 + $0x1f0] sm:$0xff] }
  0xf3   : > { %851 = vmatprep.mubr.f32.mxu0 %v532_v32  ;;  %1043 = vmatprep.mubr.f32.mxu1 %v596_v33  ;;  %v625_v31 = vld [vmem:[%s2536_s23 + $0x3f0] sm:$0xff]  ;;  %s2876_s23 = scalar_lea.hbm %s3007_s8, %s1810_s19 }
  0xf6   : > { %852 = vmatmul.mubr.f32.gmra.mrb[32].mxu0 %v531_v34  ;;  %1044 = vmatmul.mubr.f32.gmra.mrb[32].mxu1 %v595_v35 }
  0xf7   : > { %857 = vmatprep.mubr.f32.mxu0 %v534_v36  ;;  %1049 = vmatprep.mubr.f32.mxu1 %v598_v37 }
  0xfa   : > { %858 = vmatmul.mubr.f32.gmra.mrb[34].mxu0 %v533_v38  ;;  %1050 = vmatmul.mubr.f32.gmra.mrb[34].mxu1 %v597_v39 }
  0xfb   : > { %863 = vmatprep.mubr.f32.mxu0 %v536_v40  ;;  %1055 = vmatprep.mubr.f32.mxu1 %v600_v41 }
  0xfe   : > { %864 = vmatmul.mubr.f32.gmra.mrb[36].mxu0 %v535_v42  ;;  %1056 = vmatmul.mubr.f32.gmra.mrb[36].mxu1 %v599_v43 }
  0xff   : > { %869 = vmatprep.mubr.f32.mxu0 %v538_v44  ;;  %1061 = vmatprep.mubr.f32.mxu1 %v602_v45 }
 0x102   : > { %870 = vmatmul.mubr.f32.gmra.mrb[38].mxu0 %v537_v46  ;;  %1062 = vmatmul.mubr.f32.gmra.mrb[38].mxu1 %v601_v47 }
 0x103   : > { %875 = vmatprep.mubr.f32.mxu0 %v540_v48  ;;  %1067 = vmatprep.mubr.f32.mxu1 %v604_v49 }
 0x106   : > { %876 = vmatmul.mubr.f32.gmra.mrb[40].mxu0 %v539_v50  ;;  %1068 = vmatmul.mubr.f32.gmra.mrb[40].mxu1 %v603_v51 }
 0x107   : > { %881 = vmatprep.mubr.f32.mxu0 %v542_v52  ;;  %1073 = vmatprep.mubr.f32.mxu1 %v606_v53 }
 0x10a   : > { %882 = vmatmul.mubr.f32.gmra.mrb[42].mxu0 %v541_v54  ;;  %1074 = vmatmul.mubr.f32.gmra.mrb[42].mxu1 %v605_v55 }
 0x10b   : > { %887 = vmatprep.mubr.f32.mxu0 %v544_v56  ;;  %1079 = vmatprep.mubr.f32.mxu1 %v608_v57 }
 0x10e   : > { %888 = vmatmul.mubr.f32.gmra.mrb[44].mxu0 %v543_v58  ;;  %1080 = vmatmul.mubr.f32.gmra.mrb[44].mxu1 %v607_v59 }
 0x10f   : > { %893 = vmatprep.mubr.f32.mxu0 %v546_v60  ;;  %1085 = vmatprep.mubr.f32.mxu1 %v610_v61 }
 0x112   : > { %894 = vmatmul.mubr.f32.gmra.mrb[46].mxu0 %v545_v62  ;;  %1086 = vmatmul.mubr.f32.gmra.mrb[46].mxu1 %v609_v63 }
 0x113   : > { %899 = vmatprep.mubr.f32.mxu0 %v548_v0  ;;  %1091 = vmatprep.mubr.f32.mxu1 %v612_v1 }
 0x116   : > { %900 = vmatmul.mubr.f32.gmra.mrb[48].mxu0 %v547_v2  ;;  %1092 = vmatmul.mubr.f32.gmra.mrb[48].mxu1 %v611_v3 }
 0x117   : > { %905 = vmatprep.mubr.f32.mxu0 %v550_v4  ;;  %1097 = vmatprep.mubr.f32.mxu1 %v614_v5 }
 0x11a   : > { %906 = vmatmul.mubr.f32.gmra.mrb[50].mxu0 %v549_v6  ;;  %1098 = vmatmul.mubr.f32.gmra.mrb[50].mxu1 %v613_v7 }
 0x11b   : > { %911 = vmatprep.mubr.f32.mxu0 %v552_v8  ;;  %1103 = vmatprep.mubr.f32.mxu1 %v616_v9 }
 0x11e   : > { %912 = vmatmul.mubr.f32.gmra.mrb[52].mxu0 %v551_v10  ;;  %1104 = vmatmul.mubr.f32.gmra.mrb[52].mxu1 %v615_v11 }
 0x11f   : > { %917 = vmatprep.mubr.f32.mxu0 %v554_v12  ;;  %1109 = vmatprep.mubr.f32.mxu1 %v618_v13 }
 0x122   : > { %918 = vmatmul.mubr.f32.gmra.mrb[54].mxu0 %v553_v14  ;;  %1110 = vmatmul.mubr.f32.gmra.mrb[54].mxu1 %v617_v15 }
 0x123   : > { %923 = vmatprep.mubr.f32.mxu0 %v556_v16  ;;  %1115 = vmatprep.mubr.f32.mxu1 %v620_v17 }
 0x126   : > { %924 = vmatmul.mubr.f32.gmra.mrb[56].mxu0 %v555_v18  ;;  %1116 = vmatmul.mubr.f32.gmra.mrb[56].mxu1 %v619_v19 }
 0x127   : > { %929 = vmatprep.mubr.f32.mxu0 %v558_v20  ;;  %1121 = vmatprep.mubr.f32.mxu1 %v622_v21 }
 0x12a   : > { %930 = vmatmul.mubr.f32.gmra.mrb[58].mxu0 %v557_v22  ;;  %1122 = vmatmul.mubr.f32.gmra.mrb[58].mxu1 %v621_v23 }
 0x12b   : > { %935 = vmatprep.mubr.f32.mxu0 %v560_v24  ;;  %1127 = vmatprep.mubr.f32.mxu1 %v624_v25 }
 0x12e   : > { %936 = vmatmul.mubr.f32.gmra.mrb[60].mxu0 %v559_v26  ;;  %1128 = vmatmul.mubr.f32.gmra.mrb[60].mxu1 %v623_v27 }
 0x12f   : > { %941 = vmatprep.mubr.f32.mxu0 %v562_v28  ;;  %1133 = vmatprep.mubr.f32.mxu1 %v626_v29 }
 0x132   : > { %942 = vmatmul.mubr.f32.gmra.mrb[62].mxu0 %v561_v30  ;;  %1134 = vmatmul.mubr.f32.gmra.mrb[62].mxu1 %v625_v31 }
 0x189   : > { %v757_v32 = vpop.f32.mrb[0].mxu0  ;;  %v949_v33 = vpop.f32.mrb[0].mxu1 }
 0x18a   : > { %1527 = vst [vmem:[%s2744_s12] sm:$0xff] %v757_v32  ;;  %1591 = vst [vmem:[%s2744_s12 + $0x200] sm:$0xff] %v949_v33  ;;  %v759_v34 = vpop.f32.mrb[1].mxu0  ;;  %v951_v35 = vpop.f32.mrb[1].mxu1 }
 0x18b   : > { %1528 = vst [vmem:[%s2744_s12 + $0x8] sm:$0xff] %v759_v34  ;;  %1592 = vst [vmem:[%s2744_s12 + $0x208] sm:$0xff] %v951_v35 }
 0x18d   : > { %v763_v36 = vpop.f32.mrb[2].mxu0  ;;  %v955_v37 = vpop.f32.mrb[2].mxu1 }
 0x18e   : > { %1529 = vst [vmem:[%s2744_s12 + $0x10] sm:$0xff] %v763_v36  ;;  %1593 = vst [vmem:[%s2744_s12 + $0x210] sm:$0xff] %v955_v37  ;;  %v765_v38 = vpop.f32.mrb[3].mxu0  ;;  %v957_v39 = vpop.f32.mrb[3].mxu1 }
 0x18f   : > { %1530 = vst [vmem:[%s2744_s12 + $0x18] sm:$0xff] %v765_v38  ;;  %1594 = vst [vmem:[%s2744_s12 + $0x218] sm:$0xff] %v957_v39 }
 0x191   : > { %v769_v40 = vpop.f32.mrb[4].mxu0  ;;  %v961_v41 = vpop.f32.mrb[4].mxu1 }
 0x192   : > { %1531 = vst [vmem:[%s2744_s12 + $0x20] sm:$0xff] %v769_v40  ;;  %1595 = vst [vmem:[%s2744_s12 + $0x220] sm:$0xff] %v961_v41  ;;  %v771_v42 = vpop.f32.mrb[5].mxu0  ;;  %v963_v43 = vpop.f32.mrb[5].mxu1 }
 0x193   : > { %1532 = vst [vmem:[%s2744_s12 + $0x28] sm:$0xff] %v771_v42  ;;  %1596 = vst [vmem:[%s2744_s12 + $0x228] sm:$0xff] %v963_v43 }
 0x195   : > { %v775_v44 = vpop.f32.mrb[6].mxu0  ;;  %v967_v45 = vpop.f32.mrb[6].mxu1 }
 0x196   : > { %1533 = vst [vmem:[%s2744_s12 + $0x30] sm:$0xff] %v775_v44  ;;  %1597 = vst [vmem:[%s2744_s12 + $0x230] sm:$0xff] %v967_v45  ;;  %v777_v46 = vpop.f32.mrb[7].mxu0  ;;  %v969_v47 = vpop.f32.mrb[7].mxu1 }
 0x197   : > { %1534 = vst [vmem:[%s2744_s12 + $0x38] sm:$0xff] %v777_v46  ;;  %1598 = vst [vmem:[%s2744_s12 + $0x238] sm:$0xff] %v969_v47 }
 0x199   : > { %v781_v48 = vpop.f32.mrb[8].mxu0  ;;  %v973_v49 = vpop.f32.mrb[8].mxu1 }
 0x19a   : > { %1535 = vst [vmem:[%s2744_s12 + $0x40] sm:$0xff] %v781_v48  ;;  %1599 = vst [vmem:[%s2744_s12 + $0x240] sm:$0xff] %v973_v49  ;;  %v783_v50 = vpop.f32.mrb[9].mxu0  ;;  %v975_v51 = vpop.f32.mrb[9].mxu1 }
 0x19b   : > { %1536 = vst [vmem:[%s2744_s12 + $0x48] sm:$0xff] %v783_v50  ;;  %1600 = vst [vmem:[%s2744_s12 + $0x248] sm:$0xff] %v975_v51 }
 0x19d   : > { %v787_v52 = vpop.f32.mrb[10].mxu0  ;;  %v979_v53 = vpop.f32.mrb[10].mxu1 }
 0x19e   : > { %1537 = vst [vmem:[%s2744_s12 + $0x50] sm:$0xff] %v787_v52  ;;  %1601 = vst [vmem:[%s2744_s12 + $0x250] sm:$0xff] %v979_v53  ;;  %v789_v54 = vpop.f32.mrb[11].mxu0  ;;  %v981_v55 = vpop.f32.mrb[11].mxu1 }
 0x19f   : > { %1538 = vst [vmem:[%s2744_s12 + $0x58] sm:$0xff] %v789_v54  ;;  %1602 = vst [vmem:[%s2744_s12 + $0x258] sm:$0xff] %v981_v55 }
 0x1a1   : > { %v793_v56 = vpop.f32.mrb[12].mxu0  ;;  %v985_v57 = vpop.f32.mrb[12].mxu1 }
 0x1a2   : > { %1539 = vst [vmem:[%s2744_s12 + $0x60] sm:$0xff] %v793_v56  ;;  %1603 = vst [vmem:[%s2744_s12 + $0x260] sm:$0xff] %v985_v57  ;;  %v795_v58 = vpop.f32.mrb[13].mxu0  ;;  %v987_v59 = vpop.f32.mrb[13].mxu1 }
 0x1a3   : > { %1540 = vst [vmem:[%s2744_s12 + $0x68] sm:$0xff] %v795_v58  ;;  %1604 = vst [vmem:[%s2744_s12 + $0x268] sm:$0xff] %v987_v59 }
 0x1a5   : > { %v799_v60 = vpop.f32.mrb[14].mxu0  ;;  %v991_v61 = vpop.f32.mrb[14].mxu1 }
 0x1a6   : > { %1541 = vst [vmem:[%s2744_s12 + $0x70] sm:$0xff] %v799_v60  ;;  %1605 = vst [vmem:[%s2744_s12 + $0x270] sm:$0xff] %v991_v61  ;;  %v801_v62 = vpop.f32.mrb[15].mxu0  ;;  %v993_v63 = vpop.f32.mrb[15].mxu1 }
 0x1a7   : > { %1542 = vst [vmem:[%s2744_s12 + $0x78] sm:$0xff] %v801_v62  ;;  %1606 = vst [vmem:[%s2744_s12 + $0x278] sm:$0xff] %v993_v63 }
 0x1a9   : > { %v805_v0 = vpop.f32.mrb[16].mxu0  ;;  %v997_v1 = vpop.f32.mrb[16].mxu1 }
 0x1aa   : > { %1543 = vst [vmem:[%s2744_s12 + $0x80] sm:$0xff] %v805_v0  ;;  %1607 = vst [vmem:[%s2744_s12 + $0x280] sm:$0xff] %v997_v1  ;;  %v807_v2 = vpop.f32.mrb[17].mxu0  ;;  %v999_v3 = vpop.f32.mrb[17].mxu1 }
 0x1ab   : > { %1544 = vst [vmem:[%s2744_s12 + $0x88] sm:$0xff] %v807_v2  ;;  %1608 = vst [vmem:[%s2744_s12 + $0x288] sm:$0xff] %v999_v3 }
 0x1ad   : > { %v811_v4 = vpop.f32.mrb[18].mxu0  ;;  %v1003_v5 = vpop.f32.mrb[18].mxu1 }
 0x1ae   : > { %1545 = vst [vmem:[%s2744_s12 + $0x90] sm:$0xff] %v811_v4  ;;  %1609 = vst [vmem:[%s2744_s12 + $0x290] sm:$0xff] %v1003_v5  ;;  %v813_v6 = vpop.f32.mrb[19].mxu0  ;;  %v1005_v7 = vpop.f32.mrb[19].mxu1 }
 0x1af   : > { %1546 = vst [vmem:[%s2744_s12 + $0x98] sm:$0xff] %v813_v6  ;;  %1610 = vst [vmem:[%s2744_s12 + $0x298] sm:$0xff] %v1005_v7 }
 0x1b1   : > { %v817_v8 = vpop.f32.mrb[20].mxu0  ;;  %v1009_v9 = vpop.f32.mrb[20].mxu1 }
 0x1b2   : > { %1547 = vst [vmem:[%s2744_s12 + $0xa0] sm:$0xff] %v817_v8  ;;  %1611 = vst [vmem:[%s2744_s12 + $0x2a0] sm:$0xff] %v1009_v9  ;;  %v819_v10 = vpop.f32.mrb[21].mxu0  ;;  %v1011_v11 = vpop.f32.mrb[21].mxu1 }
 0x1b3   : > { %1548 = vst [vmem:[%s2744_s12 + $0xa8] sm:$0xff] %v819_v10  ;;  %1612 = vst [vmem:[%s2744_s12 + $0x2a8] sm:$0xff] %v1011_v11 }
 0x1b5   : > { %v823_v12 = vpop.f32.mrb[22].mxu0  ;;  %v1015_v13 = vpop.f32.mrb[22].mxu1 }
 0x1b6   : > { %1549 = vst [vmem:[%s2744_s12 + $0xb0] sm:$0xff] %v823_v12  ;;  %1613 = vst [vmem:[%s2744_s12 + $0x2b0] sm:$0xff] %v1015_v13  ;;  %v825_v14 = vpop.f32.mrb[23].mxu0  ;;  %v1017_v15 = vpop.f32.mrb[23].mxu1 }
 0x1b7   : > { %1550 = vst [vmem:[%s2744_s12 + $0xb8] sm:$0xff] %v825_v14  ;;  %1614 = vst [vmem:[%s2744_s12 + $0x2b8] sm:$0xff] %v1017_v15 }
 0x1b9   : > { %v829_v16 = vpop.f32.mrb[24].mxu0  ;;  %v1021_v17 = vpop.f32.mrb[24].mxu1 }
 0x1ba   : > { %1551 = vst [vmem:[%s2744_s12 + $0xc0] sm:$0xff] %v829_v16  ;;  %1615 = vst [vmem:[%s2744_s12 + $0x2c0] sm:$0xff] %v1021_v17  ;;  %v831_v18 = vpop.f32.mrb[25].mxu0  ;;  %v1023_v19 = vpop.f32.mrb[25].mxu1 }
 0x1bb   : > { %1552 = vst [vmem:[%s2744_s12 + $0xc8] sm:$0xff] %v831_v18  ;;  %1616 = vst [vmem:[%s2744_s12 + $0x2c8] sm:$0xff] %v1023_v19 }
 0x1bd   : > { %v835_v20 = vpop.f32.mrb[26].mxu0  ;;  %v1027_v21 = vpop.f32.mrb[26].mxu1 }
 0x1be   : > { %1553 = vst [vmem:[%s2744_s12 + $0xd0] sm:$0xff] %v835_v20  ;;  %1617 = vst [vmem:[%s2744_s12 + $0x2d0] sm:$0xff] %v1027_v21  ;;  %v837_v22 = vpop.f32.mrb[27].mxu0  ;;  %v1029_v23 = vpop.f32.mrb[27].mxu1 }
 0x1bf   : > { %1554 = vst [vmem:[%s2744_s12 + $0xd8] sm:$0xff] %v837_v22  ;;  %1618 = vst [vmem:[%s2744_s12 + $0x2d8] sm:$0xff] %v1029_v23 }
 0x1c1   : > { %v841_v24 = vpop.f32.mrb[28].mxu0  ;;  %v1033_v25 = vpop.f32.mrb[28].mxu1 }
 0x1c2   : > { %1555 = vst [vmem:[%s2744_s12 + $0xe0] sm:$0xff] %v841_v24  ;;  %1619 = vst [vmem:[%s2744_s12 + $0x2e0] sm:$0xff] %v1033_v25  ;;  %v843_v26 = vpop.f32.mrb[29].mxu0  ;;  %v1035_v27 = vpop.f32.mrb[29].mxu1 }
 0x1c3   : > { %1556 = vst [vmem:[%s2744_s12 + $0xe8] sm:$0xff] %v843_v26  ;;  %1620 = vst [vmem:[%s2744_s12 + $0x2e8] sm:$0xff] %v1035_v27 }
 0x1c5   : > { %v847_v28 = vpop.f32.mrb[30].mxu0  ;;  %v1039_v29 = vpop.f32.mrb[30].mxu1 }
 0x1c6   : > { %1557 = vst [vmem:[%s2744_s12 + $0xf0] sm:$0xff] %v847_v28  ;;  %1621 = vst [vmem:[%s2744_s12 + $0x2f0] sm:$0xff] %v1039_v29  ;;  %v849_v30 = vpop.f32.mrb[31].mxu0  ;;  %v1041_v31 = vpop.f32.mrb[31].mxu1 }
 0x1c7   : > { %1558 = vst [vmem:[%s2744_s12 + $0xf8] sm:$0xff] %v849_v30  ;;  %1622 = vst [vmem:[%s2744_s12 + $0x2f8] sm:$0xff] %v1041_v31 }
 0x1c9   : > { %v853_v32 = vpop.f32.mrb[32].mxu0  ;;  %v1045_v33 = vpop.f32.mrb[32].mxu1 }
 0x1ca   : > { %1559 = vst [vmem:[%s2744_s12 + $0x100] sm:$0xff] %v853_v32  ;;  %1623 = vst [vmem:[%s2744_s12 + $0x300] sm:$0xff] %v1045_v33  ;;  %v855_v34 = vpop.f32.mrb[33].mxu0  ;;  %v1047_v35 = vpop.f32.mrb[33].mxu1 }
 0x1cb   : > { %1560 = vst [vmem:[%s2744_s12 + $0x108] sm:$0xff] %v855_v34  ;;  %1624 = vst [vmem:[%s2744_s12 + $0x308] sm:$0xff] %v1047_v35 }
 0x1cd   : > { %v859_v36 = vpop.f32.mrb[34].mxu0  ;;  %v1051_v37 = vpop.f32.mrb[34].mxu1 }
 0x1ce   : > { %1561 = vst [vmem:[%s2744_s12 + $0x110] sm:$0xff] %v859_v36  ;;  %1625 = vst [vmem:[%s2744_s12 + $0x310] sm:$0xff] %v1051_v37  ;;  %v861_v38 = vpop.f32.mrb[35].mxu0  ;;  %v1053_v39 = vpop.f32.mrb[35].mxu1 }
 0x1cf   : > { %1562 = vst [vmem:[%s2744_s12 + $0x118] sm:$0xff] %v861_v38  ;;  %1626 = vst [vmem:[%s2744_s12 + $0x318] sm:$0xff] %v1053_v39 }
 0x1d1   : > { %v865_v40 = vpop.f32.mrb[36].mxu0  ;;  %v1057_v41 = vpop.f32.mrb[36].mxu1 }
 0x1d2   : > { %1563 = vst [vmem:[%s2744_s12 + $0x120] sm:$0xff] %v865_v40  ;;  %1627 = vst [vmem:[%s2744_s12 + $0x320] sm:$0xff] %v1057_v41  ;;  %v867_v42 = vpop.f32.mrb[37].mxu0  ;;  %v1059_v43 = vpop.f32.mrb[37].mxu1 }
 0x1d3   : > { %1564 = vst [vmem:[%s2744_s12 + $0x128] sm:$0xff] %v867_v42  ;;  %1628 = vst [vmem:[%s2744_s12 + $0x328] sm:$0xff] %v1059_v43 }
 0x1d5   : > { %v871_v44 = vpop.f32.mrb[38].mxu0  ;;  %v1063_v45 = vpop.f32.mrb[38].mxu1 }
 0x1d6   : > { %1565 = vst [vmem:[%s2744_s12 + $0x130] sm:$0xff] %v871_v44  ;;  %1629 = vst [vmem:[%s2744_s12 + $0x330] sm:$0xff] %v1063_v45  ;;  %v873_v46 = vpop.f32.mrb[39].mxu0  ;;  %v1065_v47 = vpop.f32.mrb[39].mxu1 }
 0x1d7   : > { %1566 = vst [vmem:[%s2744_s12 + $0x138] sm:$0xff] %v873_v46  ;;  %1630 = vst [vmem:[%s2744_s12 + $0x338] sm:$0xff] %v1065_v47 }
 0x1d9   : > { %v877_v48 = vpop.f32.mrb[40].mxu0  ;;  %v1069_v49 = vpop.f32.mrb[40].mxu1 }
 0x1da   : > { %1567 = vst [vmem:[%s2744_s12 + $0x140] sm:$0xff] %v877_v48  ;;  %1631 = vst [vmem:[%s2744_s12 + $0x340] sm:$0xff] %v1069_v49  ;;  %v879_v50 = vpop.f32.mrb[41].mxu0  ;;  %v1071_v51 = vpop.f32.mrb[41].mxu1 }
 0x1db   : > { %1568 = vst [vmem:[%s2744_s12 + $0x148] sm:$0xff] %v879_v50  ;;  %1632 = vst [vmem:[%s2744_s12 + $0x348] sm:$0xff] %v1071_v51 }
 0x1dd   : > { %v883_v52 = vpop.f32.mrb[42].mxu0  ;;  %v1075_v53 = vpop.f32.mrb[42].mxu1 }
 0x1de   : > { %1569 = vst [vmem:[%s2744_s12 + $0x150] sm:$0xff] %v883_v52  ;;  %1633 = vst [vmem:[%s2744_s12 + $0x350] sm:$0xff] %v1075_v53  ;;  %v885_v54 = vpop.f32.mrb[43].mxu0  ;;  %v1077_v55 = vpop.f32.mrb[43].mxu1 }
 0x1df   : > { %1570 = vst [vmem:[%s2744_s12 + $0x158] sm:$0xff] %v885_v54  ;;  %1634 = vst [vmem:[%s2744_s12 + $0x358] sm:$0xff] %v1077_v55 }
 0x1e1   : > { %v889_v56 = vpop.f32.mrb[44].mxu0  ;;  %v1081_v57 = vpop.f32.mrb[44].mxu1 }
 0x1e2   : > { %1571 = vst [vmem:[%s2744_s12 + $0x160] sm:$0xff] %v889_v56  ;;  %1635 = vst [vmem:[%s2744_s12 + $0x360] sm:$0xff] %v1081_v57  ;;  %v891_v58 = vpop.f32.mrb[45].mxu0  ;;  %v1083_v59 = vpop.f32.mrb[45].mxu1 }
 0x1e3   : > { %1572 = vst [vmem:[%s2744_s12 + $0x168] sm:$0xff] %v891_v58  ;;  %1636 = vst [vmem:[%s2744_s12 + $0x368] sm:$0xff] %v1083_v59 }
 0x1e5   : > { %v895_v60 = vpop.f32.mrb[46].mxu0  ;;  %v1087_v61 = vpop.f32.mrb[46].mxu1 }
 0x1e6   : > { %1573 = vst [vmem:[%s2744_s12 + $0x170] sm:$0xff] %v895_v60  ;;  %1637 = vst [vmem:[%s2744_s12 + $0x370] sm:$0xff] %v1087_v61  ;;  %v897_v62 = vpop.f32.mrb[47].mxu0  ;;  %v1089_v63 = vpop.f32.mrb[47].mxu1 }
 0x1e7   : > { %1574 = vst [vmem:[%s2744_s12 + $0x178] sm:$0xff] %v897_v62  ;;  %1638 = vst [vmem:[%s2744_s12 + $0x378] sm:$0xff] %v1089_v63 }
 0x1e9   : > { %v901_v0 = vpop.f32.mrb[48].mxu0  ;;  %v1093_v1 = vpop.f32.mrb[48].mxu1 }
 0x1ea   : > { %1575 = vst [vmem:[%s2744_s12 + $0x180] sm:$0xff] %v901_v0  ;;  %1639 = vst [vmem:[%s2744_s12 + $0x380] sm:$0xff] %v1093_v1  ;;  %v903_v2 = vpop.f32.mrb[49].mxu0  ;;  %v1095_v3 = vpop.f32.mrb[49].mxu1 }
 0x1eb   : > { %1576 = vst [vmem:[%s2744_s12 + $0x188] sm:$0xff] %v903_v2  ;;  %1640 = vst [vmem:[%s2744_s12 + $0x388] sm:$0xff] %v1095_v3 }
 0x1ed   : > { %v907_v4 = vpop.f32.mrb[50].mxu0  ;;  %v1099_v5 = vpop.f32.mrb[50].mxu1 }
 0x1ee   : > { %1577 = vst [vmem:[%s2744_s12 + $0x190] sm:$0xff] %v907_v4  ;;  %1641 = vst [vmem:[%s2744_s12 + $0x390] sm:$0xff] %v1099_v5  ;;  %v909_v6 = vpop.f32.mrb[51].mxu0  ;;  %v1101_v7 = vpop.f32.mrb[51].mxu1 }
 0x1ef   : > { %1578 = vst [vmem:[%s2744_s12 + $0x198] sm:$0xff] %v909_v6  ;;  %1642 = vst [vmem:[%s2744_s12 + $0x398] sm:$0xff] %v1101_v7 }
 0x1f1   : > { %v913_v8 = vpop.f32.mrb[52].mxu0  ;;  %v1105_v9 = vpop.f32.mrb[52].mxu1 }
 0x1f2   : > { %1579 = vst [vmem:[%s2744_s12 + $0x1a0] sm:$0xff] %v913_v8  ;;  %1643 = vst [vmem:[%s2744_s12 + $0x3a0] sm:$0xff] %v1105_v9  ;;  %v915_v10 = vpop.f32.mrb[53].mxu0  ;;  %v1107_v11 = vpop.f32.mrb[53].mxu1 }
 0x1f3   : > { %1580 = vst [vmem:[%s2744_s12 + $0x1a8] sm:$0xff] %v915_v10  ;;  %1644 = vst [vmem:[%s2744_s12 + $0x3a8] sm:$0xff] %v1107_v11 }
 0x1f5   : > { %v919_v12 = vpop.f32.mrb[54].mxu0  ;;  %v1111_v13 = vpop.f32.mrb[54].mxu1 }
 0x1f6   : > { %1581 = vst [vmem:[%s2744_s12 + $0x1b0] sm:$0xff] %v919_v12  ;;  %1645 = vst [vmem:[%s2744_s12 + $0x3b0] sm:$0xff] %v1111_v13  ;;  %v921_v14 = vpop.f32.mrb[55].mxu0  ;;  %v1113_v15 = vpop.f32.mrb[55].mxu1 }
 0x1f7   : > { %1582 = vst [vmem:[%s2744_s12 + $0x1b8] sm:$0xff] %v921_v14  ;;  %1646 = vst [vmem:[%s2744_s12 + $0x3b8] sm:$0xff] %v1113_v15 }
 0x1f9   : > { %v925_v16 = vpop.f32.mrb[56].mxu0  ;;  %v1117_v17 = vpop.f32.mrb[56].mxu1 }
 0x1fa   : > { %1583 = vst [vmem:[%s2744_s12 + $0x1c0] sm:$0xff] %v925_v16  ;;  %1647 = vst [vmem:[%s2744_s12 + $0x3c0] sm:$0xff] %v1117_v17  ;;  %v927_v18 = vpop.f32.mrb[57].mxu0  ;;  %v1119_v19 = vpop.f32.mrb[57].mxu1 }
 0x1fb   : > { %1584 = vst [vmem:[%s2744_s12 + $0x1c8] sm:$0xff] %v927_v18  ;;  %1648 = vst [vmem:[%s2744_s12 + $0x3c8] sm:$0xff] %v1119_v19 }
 0x1fd   : > { %v931_v20 = vpop.f32.mrb[58].mxu0  ;;  %v1123_v21 = vpop.f32.mrb[58].mxu1 }
 0x1fe   : > { %1585 = vst [vmem:[%s2744_s12 + $0x1d0] sm:$0xff] %v931_v20  ;;  %1649 = vst [vmem:[%s2744_s12 + $0x3d0] sm:$0xff] %v1123_v21  ;;  %v933_v22 = vpop.f32.mrb[59].mxu0  ;;  %v1125_v23 = vpop.f32.mrb[59].mxu1 }
 0x1ff   : > { %1586 = vst [vmem:[%s2744_s12 + $0x1d8] sm:$0xff] %v933_v22  ;;  %1650 = vst [vmem:[%s2744_s12 + $0x3d8] sm:$0xff] %v1125_v23 }
 0x201   : > { %v937_v24 = vpop.f32.mrb[60].mxu0  ;;  %v1129_v25 = vpop.f32.mrb[60].mxu1 }
 0x202   : > { %1587 = vst [vmem:[%s2744_s12 + $0x1e0] sm:$0xff] %v937_v24  ;;  %1651 = vst [vmem:[%s2744_s12 + $0x3e0] sm:$0xff] %v1129_v25  ;;  %v939_v26 = vpop.f32.mrb[61].mxu0  ;;  %v1131_v27 = vpop.f32.mrb[61].mxu1 }
 0x203   : > { %1588 = vst [vmem:[%s2744_s12 + $0x1e8] sm:$0xff] %v939_v26  ;;  %1652 = vst [vmem:[%s2744_s12 + $0x3e8] sm:$0xff] %v1131_v27 }
 0x205   : > { %v943_v28 = vpop.f32.mrb[62].mxu0  ;;  %v1135_v29 = vpop.f32.mrb[62].mxu1 }
 0x206   : > { %1589 = vst [vmem:[%s2744_s12 + $0x1f0] sm:$0xff] %v943_v28  ;;  %1653 = vst [vmem:[%s2744_s12 + $0x3f0] sm:$0xff] %v1135_v29  ;;  %v945_v30 = vpop.f32.mrb[63].mxu0  ;;  %v1137_v31 = vpop.f32.mrb[63].mxu1 }
 0x207   : > { %1590 = vst [vmem:[%s2744_s12 + $0x1f8] sm:$0xff] %v945_v30  ;;  %1654 = vst [vmem:[%s2744_s12 + $0x3f8] sm:$0xff] %v1137_v31 }
 0x208   : > { %2123 = shalt.err (!%p2120_p11)
}
 0x209   : > { %s2124_s28 = scalar_lea.hbm %s2876_s23, 16384  ;;  %s2128_s26 = scalar_lea.hbm %s3007_s8, 98304 }
 0x20a   : > { %p2125_p2 = scmp.ne.s32.totalorder %s2876_s23, %s2124_s28  ;;  %p2129_p7 = scmp.lt.u32.totalorder %s2876_s23, %s3007_s8 }
 0x20b   : > { %p2130_p13 = scmp.lt.u32.totalorder %s2128_s26, %s2124_s28  ;;  %p2132_p1 = scmp.lt.u32.totalorder %s2124_s28, %s2876_s23 }
 0x20c   : > { %p2126_p5 = pnand %p2125_p2, %p3008_p12 }
 0x20d   : > { %p2131_p6 = por %p2130_p13, %p2129_p7 }
 0x20e   : > { %p2127_p3 = pneg %p2126_p5 }
 0x20f   : > { %p2133_p9 = por %p2132_p1, %p2131_p6 }
 0x211   : > { %p2134_p0 = pnand %p2133_p9, %p2127_p3 }
 0x213   : > { %2137 = shalt.err (!%p2134_p0)
}
 0x214   : > { %s2268_s19 = smov 256   ;;  %s2269_s4 = smov 768  }
 0x215   : > { %s2270_s15 = smov 16  }
 0x216   : > { %1917 = dma.vmem_to_hbm [thread:$0]  (%p3008_p12), %s2878_s18, 16384, %s2876_s23, %s2886_s5, %s2268_s19, %s2269_s4, %s2270_s15  }
 0x217 PF: > { %p1931_p4 = scmp.ge.s32.totalorder %s2260_s22, 2  ;;  %s1687_s25 = sand.u32 1, %s2208_s9  }
 0x218   : > { %p3009_p10 = scmp.ne.s32.totalorder %s2998_s27, 0  ;;  %s1688_s2 = scalar_lea.sflag [#allocation5], %s1687_s25 }
 0x21a   : > { %p1927_p8 = pnand %p1931_p4, %p3009_p10 }
 0x21c   : > { %2203 = dma.done.wait (!%p1927_p8), %s1688_s2, 16384  }
 0x21d   : > { %2205 = vsyncadd (!%p1927_p8), %s1688_s2, 4294950912  ;;  %s21_s22 = sadd.s32 1, %s2260_s22   ;;  %s3011_s18 = sld [smem:[#allocation16_spill]] }
 0x21e   : > { %p2915_p11 = scmp.ge.s32.totalorder %s21_s22, 8   ;;  %s3012_s19 = sld [smem:[#allocation13_spill]] }
 0x21f   : > { %s3013_s27 = sld [smem:[#allocation14_spill]]  ;;  %s3014_s21 = sld [smem:[#allocation15_spill]] }
 0x220   : > { %s3015_s9 = smov %s2212_s10  ;;  %s3016_s10 = smov %s2216_s11 }
 0x221   : > { %s3017_s11 = smov %s2480_s30  ;;  %s3018_s12 = smov %s2224_s13 }
 0x222   : > { %s3019_s13 = smov %s2228_s14  ;;  %s3021_s15 = smov %s2236_s16 }
 0x223   : > { %s3020_s14 = smov %s3011_s18  ;;  %s3022_s16 = smov %s2240_s17 }
 0x224   : > { %s3023_s17 = smov %s2477_s0  ;;  %s3024_s18 = smov %s2252_s20 }
 0x225   : > { %s3025_s20 = smov %s3013_s27  ;;  %20 = sbr.rel (!%p2915_p11) target bundleno = 15 (0xf), region = 94 }
 0x22c   :  { %1693 = vsyncpa [#allocation4], 1 }
 0x22d   :  { %1695 = vsyncpa [#allocation4 + $0x1], 1 }
 0x22e   :  { %1696 = vsyncpa [#allocation7], 1 }
 0x22f   :  { %1698 = vsyncpa [#allocation7 + $0x1], 1 }
 0x230   :  { %1699 = vsyncpa [#allocation5], 1 }
 0x231   :  { %1701 = vsyncpa [#allocation5 + $0x1], 1 }

</bundles_post_ra>
